<compile_context>
chip_gen: v6e
topology: v6e:2x2x1
jax: 0.10.0
libtpu: 0.0.40
codegen_flags: <defaults>
</compile_context>

<pallas_src>
import functools

import jax
import jax.numpy as jnp
from jax.experimental import pallas as pl
from jax.experimental.pallas import tpu as pltpu


# ---------------------------------------------------------------------------
# Fused kernel body
# ---------------------------------------------------------------------------
def _dcgan_fused_kernel(a_ref, r1_ref, m1_ref, r2_ref, m2_ref, r3_ref, m3_ref,
                        r4_ref, m4_ref, out_ref, *, apply_sigmoid):
    def conv_block(a, r_ref, m_ref, leaky):
        acc = None
        for i in range(r_ref.shape[0]):          # 4 kernel rows, unrolled
            t = jnp.dot(r_ref[i], a, preferred_element_type=jnp.float32)
            u = jnp.dot(t, m_ref[i], preferred_element_type=jnp.float32)
            acc = u if acc is None else acc + u
        if leaky:
            acc = jnp.where(acc >= 0, acc, jnp.float32(0.2) * acc)
        return acc

    a = a_ref[...].astype(jnp.float32)
    a = conv_block(a, r1_ref, m1_ref, leaky=True)    # (B*16, 16*df)
    a = conv_block(a, r2_ref, m2_ref, leaky=True)    # (B*8,   8*2df)
    a = conv_block(a, r3_ref, m3_ref, leaky=True)    # (B*4,   4*4df)
    a = conv_block(a, r4_ref, m4_ref, leaky=False)   # (B, 1)
    if apply_sigmoid:
        a = jax.nn.sigmoid(a)
    out_ref[...] = a.astype(out_ref.dtype)


# ---------------------------------------------------------------------------
# Weight-only preprocessing (plain JAX, outside the kernel)
# ---------------------------------------------------------------------------
def _build_r(batch, h_in, h_out, stride, pad, i):
    """R_i[b*h_out+ho, b*h_in+r] = 1 iff r == stride*ho + i - pad (in range)."""
    target = stride * jnp.arange(h_out) + i - pad                      # (h_out,)
    sel = (jnp.arange(h_in)[None, :] == target[:, None]).astype(jnp.float32)
    return jnp.kron(jnp.eye(batch, dtype=jnp.float32), sel)            # (B*h_out, B*h_in)


def _build_m(weight, i, w_in, stride, pad, w_out):
    """M_i[s*C+c, wo*O+o] = weight[o, c, i, s + pad - stride*wo] (valid j) else 0."""
    O, C, KH, KW = weight.shape
    s = jnp.arange(w_in)
    wo = jnp.arange(w_out)
    j = s[:, None] + pad - stride * wo[None, :]                        # (w_in, w_out)
    valid = (j >= 0) & (j < KW)
    j_c = jnp.clip(j, 0, KW - 1)
    w_i = jnp.transpose(weight[:, :, i, :], (2, 1, 0))                 # (KW, C, O)
    m = w_i[j_c] * valid[:, :, None, None].astype(weight.dtype)        # (w_in, w_out, C, O)
    m = jnp.transpose(m, (0, 2, 1, 3)).reshape(w_in * C, w_out * O)    # (s*C+c, wo*O+o)
    return m.astype(jnp.float32)


def _full_spec(shape):
    n = len(shape)
    return pl.BlockSpec(tuple(shape), lambda i, _n=n: (0,) * _n)


# ---------------------------------------------------------------------------
# DCGAN discriminator forward
# ---------------------------------------------------------------------------
def dcgan_discriminator(noise, labels, params, img_size, feat_matching=False):
    # TODO(synk): embedding lookup + channel concat are boundary gathers done
    # in XLA glue (no clean in-kernel equivalent for a data-dependent gather
    # this small); everything after it runs in one fused Pallas kernel.
    B = noise.shape[0]
    emb = params["embed"][labels].reshape(B, 1, img_size, img_size)
    x = jnp.concatenate([noise.astype(jnp.float32), emb.astype(jnp.float32)], axis=1)

    # NCHW -> lane-dense slab A[b*H + h, w*C + c]
    a1 = x.transpose(0, 2, 3, 1).reshape(B * img_size, img_size * x.shape[1])
    a1 = a1.astype(jnp.float32)

    weights = [params["w1"], params["w2"], params["w3"], params["w4"]]
    strides = [2, 2, 2, 1]
    pads = [1, 1, 1, 0]

    inputs = [a1]
    h = img_size
    out_rows = B
    for w, st, p in zip(weights, strides, pads):
        O, C, KH, KW = w.shape
        ho = (h + 2 * p - KH) // st + 1
        r_stack = jnp.stack([_build_r(B, h, ho, st, p, i) for i in range(KH)])
        m_stack = jnp.stack([_build_m(w, i, h, st, p, ho) for i in range(KH)])
        inputs += [r_stack, m_stack]
        h = ho
        out_rows = B * ho

    kernel = functools.partial(_dcgan_fused_kernel, apply_sigmoid=not feat_matching)
    out = pl.pallas_call(
        kernel,
        out_shape=jax.ShapeDtypeStruct((B, 1), jnp.float32),
        grid=(1,),
        in_specs=[_full_spec(t.shape) for t in inputs],
        out_specs=_full_spec((B, 1)),
        compiler_params=pltpu.CompilerParams(dimension_semantics=("arbitrary",)),
    )(*inputs)
    return out.reshape(B, 1, 1, 1)


# ---------------------------------------------------------------------------
# Pure-JAX reference (for correctness check)
# ---------------------------------------------------------------------------
def _ref_conv(x, w, stride, pad):
    return jax.lax.conv_general_dilated(
        x, w, window_strides=(stride, stride),
        padding=((pad, pad), (pad, pad)),
        dimension_numbers=("NCHW", "OIHW", "NCHW"),
    )


def dcgan_discriminator_ref(noise, labels, params, img_size):
    emb = params["embed"][labels].reshape(labels.shape[0], 1, img_size, img_size)
    x = jnp.concatenate([noise.astype(jnp.float32), emb], axis=1)
    lrelu = lambda v: jnp.where(v >= 0, v, 0.2 * v)
    x = lrelu(_ref_conv(x, params["w1"], 2, 1))
    x = lrelu(_ref_conv(x, params["w2"], 2, 1))
    x = lrelu(_ref_conv(x, params["w3"], 2, 1))
    feats = _ref_conv(x, params["w4"], 1, 0)
    return feats, jax.nn.sigmoid(feats)


# ---------------------------------------------------------------------------
if __name__ == "__main__":
    batch = 2
    channels_img = 3
    disc_features = 8
    num_classes = 10
    img_size = 32  # required so the final 4x4 valid conv maps 4x4 -> 1x1

    key = jax.random.PRNGKey(0)
    k_noise, k_lab, k_e, k1, k2, k3, k4 = jax.random.split(key, 7)

    noise = jax.random.normal(k_noise, (batch, channels_img, img_size, img_size),
                              dtype=jnp.float32)
    labels = jax.random.randint(k_lab, (batch,), 0, num_classes)

    def init_w(k, shape, scale=0.05):
        return (scale * jax.random.normal(k, shape)).astype(jnp.float32)

    params = {
        "embed": init_w(k_e, (num_classes, img_size * img_size), scale=1.0),
        # Conv2d(channels_img+1, df, 4, 2, 1, bias=False)
        "w1": init_w(k1, (disc_features, channels_img + 1, 4, 4)),
        # Conv2d(df, 2df, 4, 2, 1, bias=False)
        "w2": init_w(k2, (disc_features * 2, disc_features, 4, 4)),
        # Conv2d(2df, 4df, 4, 2, 1, bias=False)
        "w3": init_w(k3, (disc_features * 4, disc_features * 2, 4, 4)),
        # Conv2d(4df, 1, 4, 1, 0, bias=False)
        "w4": init_w(k4, (1, disc_features * 4, 4, 4)),
    }

    pred = dcgan_discriminator(noise, labels, params, img_size)
    feats = dcgan_discriminator(noise, labels, params, img_size, feat_matching=True)
    pred, feats = jax.block_until_ready((pred, feats))
    assert pred.shape == (batch, 1, 1, 1), pred.shape
    assert feats.shape == (batch, 1, 1, 1), feats.shape

    ref_feats, ref_pred = dcgan_discriminator_ref(noise, labels, params, img_size)
    ref_feats, ref_pred = jax.block_until_ready((ref_feats, ref_pred))
    assert jnp.allclose(pred, ref_pred, atol=1e-4, rtol=1e-4), (pred, ref_pred)
    assert jnp.allclose(feats, ref_feats, atol=1e-4, rtol=1e-4), (feats, ref_feats)

    print("KERNEL_OK")
</pallas_src>

<mosaic_0001>
module attributes {stable_mosaic.version = 11 : i64} {
  func.func @_dcgan_fused_kernel(%arg0: i32, %arg1: memref<64x128xf32, #tpu.memory_space<vmem>>, %arg2: memref<4x32x64xf32, #tpu.memory_space<vmem>>, %arg3: memref<4x128x128xf32, #tpu.memory_space<vmem>>, %arg4: memref<4x16x32xf32, #tpu.memory_space<vmem>>, %arg5: memref<4x128x128xf32, #tpu.memory_space<vmem>>, %arg6: memref<4x8x16xf32, #tpu.memory_space<vmem>>, %arg7: memref<4x128x128xf32, #tpu.memory_space<vmem>>, %arg8: memref<4x2x8xf32, #tpu.memory_space<vmem>>, %arg9: memref<4x128x1xf32, #tpu.memory_space<vmem>>, %arg10: memref<2x1xf32, #tpu.memory_space<vmem>>) attributes {dimension_semantics = [#tpu.dimension_semantics<arbitrary>], iteration_bounds = array<i64: 1>, scalar_prefetch = 0 : i64, scratch_operands = 0 : i64, tpu.core_type = #tpu.core_type<tc>, window_params = [{pipeline_mode = #tpu.pipeline_mode<synchronous>, transform_indices = @transform_0, window_bounds = array<i64: 64, 128>}, {pipeline_mode = #tpu.pipeline_mode<synchronous>, transform_indices = @transform_1, window_bounds = array<i64: 4, 32, 64>}, {pipeline_mode = #tpu.pipeline_mode<synchronous>, transform_indices = @transform_2, window_bounds = array<i64: 4, 128, 128>}, {pipeline_mode = #tpu.pipeline_mode<synchronous>, transform_indices = @transform_3, window_bounds = array<i64: 4, 16, 32>}, {pipeline_mode = #tpu.pipeline_mode<synchronous>, transform_indices = @transform_4, window_bounds = array<i64: 4, 128, 128>}, {pipeline_mode = #tpu.pipeline_mode<synchronous>, transform_indices = @transform_5, window_bounds = array<i64: 4, 8, 16>}, {pipeline_mode = #tpu.pipeline_mode<synchronous>, transform_indices = @transform_6, window_bounds = array<i64: 4, 128, 128>}, {pipeline_mode = #tpu.pipeline_mode<synchronous>, transform_indices = @transform_7, window_bounds = array<i64: 4, 2, 8>}, {pipeline_mode = #tpu.pipeline_mode<synchronous>, transform_indices = @transform_8, window_bounds = array<i64: 4, 128, 1>}, {pipeline_mode = #tpu.pipeline_mode<synchronous>, transform_indices = @transform_9, window_bounds = array<i64: 2, 1>}]} {
    %c0 = arith.constant 0 : index
    %c0_0 = arith.constant 0 : index
    %0 = vector.load %arg1[%c0, %c0_0] : memref<64x128xf32, #tpu.memory_space<vmem>>, vector<64x128xf32>
    %c0_1 = arith.constant 0 : index
    %c0_2 = arith.constant 0 : index
    %c0_3 = arith.constant 0 : index
    %1 = vector.load %arg2[%c0_1, %c0_2, %c0_3] : memref<4x32x64xf32, #tpu.memory_space<vmem>>, vector<1x32x64xf32>
    %2 = vector.shape_cast %1 : vector<1x32x64xf32> to vector<32x64xf32>
    %cst = arith.constant dense<0.000000e+00> : vector<32x128xf32>
    %3 = tpu.matmul %2, %0, %cst {dimension_numbers = #tpu.dot_dimension_numbers<[1], [0], [0], [1], [0, 0, 1, 1], [], []>} : vector<32x64xf32>, vector<64x128xf32>, vector<32x128xf32> -> vector<32x128xf32>
    %c0_4 = arith.constant 0 : index
    %c0_5 = arith.constant 0 : index
    %c0_6 = arith.constant 0 : index
    %4 = vector.load %arg3[%c0_4, %c0_5, %c0_6] : memref<4x128x128xf32, #tpu.memory_space<vmem>>, vector<1x128x128xf32>
    %5 = vector.shape_cast %4 : vector<1x128x128xf32> to vector<128x128xf32>
    %cst_7 = arith.constant dense<0.000000e+00> : vector<32x128xf32>
    %6 = tpu.matmul %3, %5, %cst_7 {dimension_numbers = #tpu.dot_dimension_numbers<[1], [0], [0], [1], [0, 0, 1, 1], [], []>} : vector<32x128xf32>, vector<128x128xf32>, vector<32x128xf32> -> vector<32x128xf32>
    %c1 = arith.constant 1 : index
    %c0_8 = arith.constant 0 : index
    %c0_9 = arith.constant 0 : index
    %7 = vector.load %arg2[%c1, %c0_8, %c0_9] : memref<4x32x64xf32, #tpu.memory_space<vmem>>, vector<1x32x64xf32>
    %8 = vector.shape_cast %7 : vector<1x32x64xf32> to vector<32x64xf32>
    %cst_10 = arith.constant dense<0.000000e+00> : vector<32x128xf32>
    %9 = tpu.matmul %8, %0, %cst_10 {dimension_numbers = #tpu.dot_dimension_numbers<[1], [0], [0], [1], [0, 0, 1, 1], [], []>} : vector<32x64xf32>, vector<64x128xf32>, vector<32x128xf32> -> vector<32x128xf32>
    %c1_11 = arith.constant 1 : index
    %c0_12 = arith.constant 0 : index
    %c0_13 = arith.constant 0 : index
    %10 = vector.load %arg3[%c1_11, %c0_12, %c0_13] : memref<4x128x128xf32, #tpu.memory_space<vmem>>, vector<1x128x128xf32>
    %11 = vector.shape_cast %10 : vector<1x128x128xf32> to vector<128x128xf32>
    %cst_14 = arith.constant dense<0.000000e+00> : vector<32x128xf32>
    %12 = tpu.matmul %9, %11, %cst_14 {dimension_numbers = #tpu.dot_dimension_numbers<[1], [0], [0], [1], [0, 0, 1, 1], [], []>} : vector<32x128xf32>, vector<128x128xf32>, vector<32x128xf32> -> vector<32x128xf32>
    %13 = arith.addf %6, %12 : vector<32x128xf32>
    %c2 = arith.constant 2 : index
    %c0_15 = arith.constant 0 : index
    %c0_16 = arith.constant 0 : index
    %14 = vector.load %arg2[%c2, %c0_15, %c0_16] : memref<4x32x64xf32, #tpu.memory_space<vmem>>, vector<1x32x64xf32>
    %15 = vector.shape_cast %14 : vector<1x32x64xf32> to vector<32x64xf32>
    %cst_17 = arith.constant dense<0.000000e+00> : vector<32x128xf32>
    %16 = tpu.matmul %15, %0, %cst_17 {dimension_numbers = #tpu.dot_dimension_numbers<[1], [0], [0], [1], [0, 0, 1, 1], [], []>} : vector<32x64xf32>, vector<64x128xf32>, vector<32x128xf32> -> vector<32x128xf32>
    %c2_18 = arith.constant 2 : index
    %c0_19 = arith.constant 0 : index
    %c0_20 = arith.constant 0 : index
    %17 = vector.load %arg3[%c2_18, %c0_19, %c0_20] : memref<4x128x128xf32, #tpu.memory_space<vmem>>, vector<1x128x128xf32>
    %18 = vector.shape_cast %17 : vector<1x128x128xf32> to vector<128x128xf32>
    %cst_21 = arith.constant dense<0.000000e+00> : vector<32x128xf32>
    %19 = tpu.matmul %16, %18, %cst_21 {dimension_numbers = #tpu.dot_dimension_numbers<[1], [0], [0], [1], [0, 0, 1, 1], [], []>} : vector<32x128xf32>, vector<128x128xf32>, vector<32x128xf32> -> vector<32x128xf32>
    %20 = arith.addf %13, %19 : vector<32x128xf32>
    %c3 = arith.constant 3 : index
    %c0_22 = arith.constant 0 : index
    %c0_23 = arith.constant 0 : index
    %21 = vector.load %arg2[%c3, %c0_22, %c0_23] : memref<4x32x64xf32, #tpu.memory_space<vmem>>, vector<1x32x64xf32>
    %22 = vector.shape_cast %21 : vector<1x32x64xf32> to vector<32x64xf32>
    %cst_24 = arith.constant dense<0.000000e+00> : vector<32x128xf32>
    %23 = tpu.matmul %22, %0, %cst_24 {dimension_numbers = #tpu.dot_dimension_numbers<[1], [0], [0], [1], [0, 0, 1, 1], [], []>} : vector<32x64xf32>, vector<64x128xf32>, vector<32x128xf32> -> vector<32x128xf32>
    %c3_25 = arith.constant 3 : index
    %c0_26 = arith.constant 0 : index
    %c0_27 = arith.constant 0 : index
    %24 = vector.load %arg3[%c3_25, %c0_26, %c0_27] : memref<4x128x128xf32, #tpu.memory_space<vmem>>, vector<1x128x128xf32>
    %25 = vector.shape_cast %24 : vector<1x128x128xf32> to vector<128x128xf32>
    %cst_28 = arith.constant dense<0.000000e+00> : vector<32x128xf32>
    %26 = tpu.matmul %23, %25, %cst_28 {dimension_numbers = #tpu.dot_dimension_numbers<[1], [0], [0], [1], [0, 0, 1, 1], [], []>} : vector<32x128xf32>, vector<128x128xf32>, vector<32x128xf32> -> vector<32x128xf32>
    %27 = arith.addf %20, %26 : vector<32x128xf32>
    %cst_29 = arith.constant 0.000000e+00 : f32
    %28 = vector.broadcast %cst_29 : f32 to vector<32x128xf32>
    %29 = arith.cmpf oge, %27, %28 : vector<32x128xf32>
    %cst_30 = arith.constant 2.000000e-01 : f32
    %30 = vector.broadcast %cst_30 : f32 to vector<32x128xf32>
    %31 = arith.mulf %30, %27 : vector<32x128xf32>
    %32 = arith.select %29, %27, %31 : vector<32x128xi1>, vector<32x128xf32>
    %c0_31 = arith.constant 0 : index
    %c0_32 = arith.constant 0 : index
    %c0_33 = arith.constant 0 : index
    %33 = vector.load %arg4[%c0_31, %c0_32, %c0_33] : memref<4x16x32xf32, #tpu.memory_space<vmem>>, vector<1x16x32xf32>
    %34 = vector.shape_cast %33 : vector<1x16x32xf32> to vector<16x32xf32>
    %cst_34 = arith.constant dense<0.000000e+00> : vector<16x128xf32>
    %35 = tpu.matmul %34, %32, %cst_34 {dimension_numbers = #tpu.dot_dimension_numbers<[1], [0], [0], [1], [0, 0, 1, 1], [], []>} : vector<16x32xf32>, vector<32x128xf32>, vector<16x128xf32> -> vector<16x128xf32>
    %c0_35 = arith.constant 0 : index
    %c0_36 = arith.constant 0 : index
    %c0_37 = arith.constant 0 : index
    %36 = vector.load %arg5[%c0_35, %c0_36, %c0_37] : memref<4x128x128xf32, #tpu.memory_space<vmem>>, vector<1x128x128xf32>
    %37 = vector.shape_cast %36 : vector<1x128x128xf32> to vector<128x128xf32>
    %cst_38 = arith.constant dense<0.000000e+00> : vector<16x128xf32>
    %38 = tpu.matmul %35, %37, %cst_38 {dimension_numbers = #tpu.dot_dimension_numbers<[1], [0], [0], [1], [0, 0, 1, 1], [], []>} : vector<16x128xf32>, vector<128x128xf32>, vector<16x128xf32> -> vector<16x128xf32>
    %c1_39 = arith.constant 1 : index
    %c0_40 = arith.constant 0 : index
    %c0_41 = arith.constant 0 : index
    %39 = vector.load %arg4[%c1_39, %c0_40, %c0_41] : memref<4x16x32xf32, #tpu.memory_space<vmem>>, vector<1x16x32xf32>
    %40 = vector.shape_cast %39 : vector<1x16x32xf32> to vector<16x32xf32>
    %cst_42 = arith.constant dense<0.000000e+00> : vector<16x128xf32>
    %41 = tpu.matmul %40, %32, %cst_42 {dimension_numbers = #tpu.dot_dimension_numbers<[1], [0], [0], [1], [0, 0, 1, 1], [], []>} : vector<16x32xf32>, vector<32x128xf32>, vector<16x128xf32> -> vector<16x128xf32>
    %c1_43 = arith.constant 1 : index
    %c0_44 = arith.constant 0 : index
    %c0_45 = arith.constant 0 : index
    %42 = vector.load %arg5[%c1_43, %c0_44, %c0_45] : memref<4x128x128xf32, #tpu.memory_space<vmem>>, vector<1x128x128xf32>
    %43 = vector.shape_cast %42 : vector<1x128x128xf32> to vector<128x128xf32>
    %cst_46 = arith.constant dense<0.000000e+00> : vector<16x128xf32>
    %44 = tpu.matmul %41, %43, %cst_46 {dimension_numbers = #tpu.dot_dimension_numbers<[1], [0], [0], [1], [0, 0, 1, 1], [], []>} : vector<16x128xf32>, vector<128x128xf32>, vector<16x128xf32> -> vector<16x128xf32>
    %45 = arith.addf %38, %44 : vector<16x128xf32>
    %c2_47 = arith.constant 2 : index
    %c0_48 = arith.constant 0 : index
    %c0_49 = arith.constant 0 : index
    %46 = vector.load %arg4[%c2_47, %c0_48, %c0_49] : memref<4x16x32xf32, #tpu.memory_space<vmem>>, vector<1x16x32xf32>
    %47 = vector.shape_cast %46 : vector<1x16x32xf32> to vector<16x32xf32>
    %cst_50 = arith.constant dense<0.000000e+00> : vector<16x128xf32>
    %48 = tpu.matmul %47, %32, %cst_50 {dimension_numbers = #tpu.dot_dimension_numbers<[1], [0], [0], [1], [0, 0, 1, 1], [], []>} : vector<16x32xf32>, vector<32x128xf32>, vector<16x128xf32> -> vector<16x128xf32>
    %c2_51 = arith.constant 2 : index
    %c0_52 = arith.constant 0 : index
    %c0_53 = arith.constant 0 : index
    %49 = vector.load %arg5[%c2_51, %c0_52, %c0_53] : memref<4x128x128xf32, #tpu.memory_space<vmem>>, vector<1x128x128xf32>
    %50 = vector.shape_cast %49 : vector<1x128x128xf32> to vector<128x128xf32>
    %cst_54 = arith.constant dense<0.000000e+00> : vector<16x128xf32>
    %51 = tpu.matmul %48, %50, %cst_54 {dimension_numbers = #tpu.dot_dimension_numbers<[1], [0], [0], [1], [0, 0, 1, 1], [], []>} : vector<16x128xf32>, vector<128x128xf32>, vector<16x128xf32> -> vector<16x128xf32>
    %52 = arith.addf %45, %51 : vector<16x128xf32>
    %c3_55 = arith.constant 3 : index
    %c0_56 = arith.constant 0 : index
    %c0_57 = arith.constant 0 : index
    %53 = vector.load %arg4[%c3_55, %c0_56, %c0_57] : memref<4x16x32xf32, #tpu.memory_space<vmem>>, vector<1x16x32xf32>
    %54 = vector.shape_cast %53 : vector<1x16x32xf32> to vector<16x32xf32>
    %cst_58 = arith.constant dense<0.000000e+00> : vector<16x128xf32>
    %55 = tpu.matmul %54, %32, %cst_58 {dimension_numbers = #tpu.dot_dimension_numbers<[1], [0], [0], [1], [0, 0, 1, 1], [], []>} : vector<16x32xf32>, vector<32x128xf32>, vector<16x128xf32> -> vector<16x128xf32>
    %c3_59 = arith.constant 3 : index
    %c0_60 = arith.constant 0 : index
    %c0_61 = arith.constant 0 : index
    %56 = vector.load %arg5[%c3_59, %c0_60, %c0_61] : memref<4x128x128xf32, #tpu.memory_space<vmem>>, vector<1x128x128xf32>
    %57 = vector.shape_cast %56 : vector<1x128x128xf32> to vector<128x128xf32>
    %cst_62 = arith.constant dense<0.000000e+00> : vector<16x128xf32>
    %58 = tpu.matmul %55, %57, %cst_62 {dimension_numbers = #tpu.dot_dimension_numbers<[1], [0], [0], [1], [0, 0, 1, 1], [], []>} : vector<16x128xf32>, vector<128x128xf32>, vector<16x128xf32> -> vector<16x128xf32>
    %59 = arith.addf %52, %58 : vector<16x128xf32>
    %cst_63 = arith.constant 0.000000e+00 : f32
    %60 = vector.broadcast %cst_63 : f32 to vector<16x128xf32>
    %61 = arith.cmpf oge, %59, %60 : vector<16x128xf32>
    %cst_64 = arith.constant 2.000000e-01 : f32
    %62 = vector.broadcast %cst_64 : f32 to vector<16x128xf32>
    %63 = arith.mulf %62, %59 : vector<16x128xf32>
    %64 = arith.select %61, %59, %63 : vector<16x128xi1>, vector<16x128xf32>
    %c0_65 = arith.constant 0 : index
    %c0_66 = arith.constant 0 : index
    %c0_67 = arith.constant 0 : index
    %65 = vector.load %arg6[%c0_65, %c0_66, %c0_67] : memref<4x8x16xf32, #tpu.memory_space<vmem>>, vector<1x8x16xf32>
    %66 = vector.shape_cast %65 : vector<1x8x16xf32> to vector<8x16xf32>
    %cst_68 = arith.constant dense<0.000000e+00> : vector<8x128xf32>
    %67 = tpu.matmul %66, %64, %cst_68 {dimension_numbers = #tpu.dot_dimension_numbers<[1], [0], [0], [1], [0, 0, 1, 1], [], []>} : vector<8x16xf32>, vector<16x128xf32>, vector<8x128xf32> -> vector<8x128xf32>
    %c0_69 = arith.constant 0 : index
    %c0_70 = arith.constant 0 : index
    %c0_71 = arith.constant 0 : index
    %68 = vector.load %arg7[%c0_69, %c0_70, %c0_71] : memref<4x128x128xf32, #tpu.memory_space<vmem>>, vector<1x128x128xf32>
    %69 = vector.shape_cast %68 : vector<1x128x128xf32> to vector<128x128xf32>
    %cst_72 = arith.constant dense<0.000000e+00> : vector<8x128xf32>
    %70 = tpu.matmul %67, %69, %cst_72 {dimension_numbers = #tpu.dot_dimension_numbers<[1], [0], [0], [1], [0, 0, 1, 1], [], []>} : vector<8x128xf32>, vector<128x128xf32>, vector<8x128xf32> -> vector<8x128xf32>
    %c1_73 = arith.constant 1 : index
    %c0_74 = arith.constant 0 : index
    %c0_75 = arith.constant 0 : index
    %71 = vector.load %arg6[%c1_73, %c0_74, %c0_75] : memref<4x8x16xf32, #tpu.memory_space<vmem>>, vector<1x8x16xf32>
    %72 = vector.shape_cast %71 : vector<1x8x16xf32> to vector<8x16xf32>
    %cst_76 = arith.constant dense<0.000000e+00> : vector<8x128xf32>
    %73 = tpu.matmul %72, %64, %cst_76 {dimension_numbers = #tpu.dot_dimension_numbers<[1], [0], [0], [1], [0, 0, 1, 1], [], []>} : vector<8x16xf32>, vector<16x128xf32>, vector<8x128xf32> -> vector<8x128xf32>
    %c1_77 = arith.constant 1 : index
    %c0_78 = arith.constant 0 : index
    %c0_79 = arith.constant 0 : index
    %74 = vector.load %arg7[%c1_77, %c0_78, %c0_79] : memref<4x128x128xf32, #tpu.memory_space<vmem>>, vector<1x128x128xf32>
    %75 = vector.shape_cast %74 : vector<1x128x128xf32> to vector<128x128xf32>
    %cst_80 = arith.constant dense<0.000000e+00> : vector<8x128xf32>
    %76 = tpu.matmul %73, %75, %cst_80 {dimension_numbers = #tpu.dot_dimension_numbers<[1], [0], [0], [1], [0, 0, 1, 1], [], []>} : vector<8x128xf32>, vector<128x128xf32>, vector<8x128xf32> -> vector<8x128xf32>
    %77 = arith.addf %70, %76 : vector<8x128xf32>
    %c2_81 = arith.constant 2 : index
    %c0_82 = arith.constant 0 : index
    %c0_83 = arith.constant 0 : index
    %78 = vector.load %arg6[%c2_81, %c0_82, %c0_83] : memref<4x8x16xf32, #tpu.memory_space<vmem>>, vector<1x8x16xf32>
    %79 = vector.shape_cast %78 : vector<1x8x16xf32> to vector<8x16xf32>
    %cst_84 = arith.constant dense<0.000000e+00> : vector<8x128xf32>
    %80 = tpu.matmul %79, %64, %cst_84 {dimension_numbers = #tpu.dot_dimension_numbers<[1], [0], [0], [1], [0, 0, 1, 1], [], []>} : vector<8x16xf32>, vector<16x128xf32>, vector<8x128xf32> -> vector<8x128xf32>
    %c2_85 = arith.constant 2 : index
    %c0_86 = arith.constant 0 : index
    %c0_87 = arith.constant 0 : index
    %81 = vector.load %arg7[%c2_85, %c0_86, %c0_87] : memref<4x128x128xf32, #tpu.memory_space<vmem>>, vector<1x128x128xf32>
    %82 = vector.shape_cast %81 : vector<1x128x128xf32> to vector<128x128xf32>
    %cst_88 = arith.constant dense<0.000000e+00> : vector<8x128xf32>
    %83 = tpu.matmul %80, %82, %cst_88 {dimension_numbers = #tpu.dot_dimension_numbers<[1], [0], [0], [1], [0, 0, 1, 1], [], []>} : vector<8x128xf32>, vector<128x128xf32>, vector<8x128xf32> -> vector<8x128xf32>
    %84 = arith.addf %77, %83 : vector<8x128xf32>
    %c3_89 = arith.constant 3 : index
    %c0_90 = arith.constant 0 : index
    %c0_91 = arith.constant 0 : index
    %85 = vector.load %arg6[%c3_89, %c0_90, %c0_91] : memref<4x8x16xf32, #tpu.memory_space<vmem>>, vector<1x8x16xf32>
    %86 = vector.shape_cast %85 : vector<1x8x16xf32> to vector<8x16xf32>
    %cst_92 = arith.constant dense<0.000000e+00> : vector<8x128xf32>
    %87 = tpu.matmul %86, %64, %cst_92 {dimension_numbers = #tpu.dot_dimension_numbers<[1], [0], [0], [1], [0, 0, 1, 1], [], []>} : vector<8x16xf32>, vector<16x128xf32>, vector<8x128xf32> -> vector<8x128xf32>
    %c3_93 = arith.constant 3 : index
    %c0_94 = arith.constant 0 : index
    %c0_95 = arith.constant 0 : index
    %88 = vector.load %arg7[%c3_93, %c0_94, %c0_95] : memref<4x128x128xf32, #tpu.memory_space<vmem>>, vector<1x128x128xf32>
    %89 = vector.shape_cast %88 : vector<1x128x128xf32> to vector<128x128xf32>
    %cst_96 = arith.constant dense<0.000000e+00> : vector<8x128xf32>
    %90 = tpu.matmul %87, %89, %cst_96 {dimension_numbers = #tpu.dot_dimension_numbers<[1], [0], [0], [1], [0, 0, 1, 1], [], []>} : vector<8x128xf32>, vector<128x128xf32>, vector<8x128xf32> -> vector<8x128xf32>
    %91 = arith.addf %84, %90 : vector<8x128xf32>
    %cst_97 = arith.constant 0.000000e+00 : f32
    %92 = vector.broadcast %cst_97 : f32 to vector<8x128xf32>
    %93 = arith.cmpf oge, %91, %92 : vector<8x128xf32>
    %cst_98 = arith.constant 2.000000e-01 : f32
    %94 = vector.broadcast %cst_98 : f32 to vector<8x128xf32>
    %95 = arith.mulf %94, %91 : vector<8x128xf32>
    %96 = arith.select %93, %91, %95 : vector<8x128xi1>, vector<8x128xf32>
    %c0_99 = arith.constant 0 : index
    %c0_100 = arith.constant 0 : index
    %c0_101 = arith.constant 0 : index
    %97 = vector.load %arg8[%c0_99, %c0_100, %c0_101] : memref<4x2x8xf32, #tpu.memory_space<vmem>>, vector<1x2x8xf32>
    %98 = vector.shape_cast %97 : vector<1x2x8xf32> to vector<2x8xf32>
    %cst_102 = arith.constant dense<0.000000e+00> : vector<2x128xf32>
    %99 = tpu.matmul %98, %96, %cst_102 {dimension_numbers = #tpu.dot_dimension_numbers<[1], [0], [0], [1], [0, 0, 1, 1], [], []>} : vector<2x8xf32>, vector<8x128xf32>, vector<2x128xf32> -> vector<2x128xf32>
    %c0_103 = arith.constant 0 : index
    %c0_104 = arith.constant 0 : index
    %c0_105 = arith.constant 0 : index
    %100 = vector.load %arg9[%c0_103, %c0_104, %c0_105] : memref<4x128x1xf32, #tpu.memory_space<vmem>>, vector<1x128x1xf32>
    %101 = vector.shape_cast %100 : vector<1x128x1xf32> to vector<128x1xf32>
    %cst_106 = arith.constant dense<0.000000e+00> : vector<2x1xf32>
    %102 = tpu.matmul %99, %101, %cst_106 {dimension_numbers = #tpu.dot_dimension_numbers<[1], [0], [0], [1], [0, 0, 1, 1], [], []>} : vector<2x128xf32>, vector<128x1xf32>, vector<2x1xf32> -> vector<2x1xf32>
    %c1_107 = arith.constant 1 : index
    %c0_108 = arith.constant 0 : index
    %c0_109 = arith.constant 0 : index
    %103 = vector.load %arg8[%c1_107, %c0_108, %c0_109] : memref<4x2x8xf32, #tpu.memory_space<vmem>>, vector<1x2x8xf32>
    %104 = vector.shape_cast %103 : vector<1x2x8xf32> to vector<2x8xf32>
    %cst_110 = arith.constant dense<0.000000e+00> : vector<2x128xf32>
    %105 = tpu.matmul %104, %96, %cst_110 {dimension_numbers = #tpu.dot_dimension_numbers<[1], [0], [0], [1], [0, 0, 1, 1], [], []>} : vector<2x8xf32>, vector<8x128xf32>, vector<2x128xf32> -> vector<2x128xf32>
    %c1_111 = arith.constant 1 : index
    %c0_112 = arith.constant 0 : index
    %c0_113 = arith.constant 0 : index
    %106 = vector.load %arg9[%c1_111, %c0_112, %c0_113] : memref<4x128x1xf32, #tpu.memory_space<vmem>>, vector<1x128x1xf32>
    %107 = vector.shape_cast %106 : vector<1x128x1xf32> to vector<128x1xf32>
    %cst_114 = arith.constant dense<0.000000e+00> : vector<2x1xf32>
    %108 = tpu.matmul %105, %107, %cst_114 {dimension_numbers = #tpu.dot_dimension_numbers<[1], [0], [0], [1], [0, 0, 1, 1], [], []>} : vector<2x128xf32>, vector<128x1xf32>, vector<2x1xf32> -> vector<2x1xf32>
    %109 = arith.addf %102, %108 : vector<2x1xf32>
    %c2_115 = arith.constant 2 : index
    %c0_116 = arith.constant 0 : index
    %c0_117 = arith.constant 0 : index
    %110 = vector.load %arg8[%c2_115, %c0_116, %c0_117] : memref<4x2x8xf32, #tpu.memory_space<vmem>>, vector<1x2x8xf32>
    %111 = vector.shape_cast %110 : vector<1x2x8xf32> to vector<2x8xf32>
    %cst_118 = arith.constant dense<0.000000e+00> : vector<2x128xf32>
    %112 = tpu.matmul %111, %96, %cst_118 {dimension_numbers = #tpu.dot_dimension_numbers<[1], [0], [0], [1], [0, 0, 1, 1], [], []>} : vector<2x8xf32>, vector<8x128xf32>, vector<2x128xf32> -> vector<2x128xf32>
    %c2_119 = arith.constant 2 : index
    %c0_120 = arith.constant 0 : index
    %c0_121 = arith.constant 0 : index
    %113 = vector.load %arg9[%c2_119, %c0_120, %c0_121] : memref<4x128x1xf32, #tpu.memory_space<vmem>>, vector<1x128x1xf32>
    %114 = vector.shape_cast %113 : vector<1x128x1xf32> to vector<128x1xf32>
    %cst_122 = arith.constant dense<0.000000e+00> : vector<2x1xf32>
    %115 = tpu.matmul %112, %114, %cst_122 {dimension_numbers = #tpu.dot_dimension_numbers<[1], [0], [0], [1], [0, 0, 1, 1], [], []>} : vector<2x128xf32>, vector<128x1xf32>, vector<2x1xf32> -> vector<2x1xf32>
    %116 = arith.addf %109, %115 : vector<2x1xf32>
    %c3_123 = arith.constant 3 : index
    %c0_124 = arith.constant 0 : index
    %c0_125 = arith.constant 0 : index
    %117 = vector.load %arg8[%c3_123, %c0_124, %c0_125] : memref<4x2x8xf32, #tpu.memory_space<vmem>>, vector<1x2x8xf32>
    %118 = vector.shape_cast %117 : vector<1x2x8xf32> to vector<2x8xf32>
    %cst_126 = arith.constant dense<0.000000e+00> : vector<2x128xf32>
    %119 = tpu.matmul %118, %96, %cst_126 {dimension_numbers = #tpu.dot_dimension_numbers<[1], [0], [0], [1], [0, 0, 1, 1], [], []>} : vector<2x8xf32>, vector<8x128xf32>, vector<2x128xf32> -> vector<2x128xf32>
    %c3_127 = arith.constant 3 : index
    %c0_128 = arith.constant 0 : index
    %c0_129 = arith.constant 0 : index
    %120 = vector.load %arg9[%c3_127, %c0_128, %c0_129] : memref<4x128x1xf32, #tpu.memory_space<vmem>>, vector<1x128x1xf32>
    %121 = vector.shape_cast %120 : vector<1x128x1xf32> to vector<128x1xf32>
    %cst_130 = arith.constant dense<0.000000e+00> : vector<2x1xf32>
    %122 = tpu.matmul %119, %121, %cst_130 {dimension_numbers = #tpu.dot_dimension_numbers<[1], [0], [0], [1], [0, 0, 1, 1], [], []>} : vector<2x128xf32>, vector<128x1xf32>, vector<2x1xf32> -> vector<2x1xf32>
    %123 = arith.addf %116, %122 : vector<2x1xf32>
    %124 = arith.negf %123 : vector<2x1xf32>
    %125 = math.exp %124 : vector<2x1xf32>
    %cst_131 = arith.constant 1.000000e+00 : f32
    %126 = vector.broadcast %cst_131 : f32 to vector<2x1xf32>
    %127 = arith.addf %126, %125 : vector<2x1xf32>
    %128 = arith.divf %126, %127 : vector<2x1xf32>
    %c0_132 = arith.constant 0 : index
    %c0_133 = arith.constant 0 : index
    %129 = vector.load %arg10[%c0_132, %c0_133] : memref<2x1xf32, #tpu.memory_space<vmem>>, vector<2x1xf32>
    tpu.vector_store %arg10[%c0_132, %c0_133], %128 {strides = array<i32>} : memref<2x1xf32, #tpu.memory_space<vmem>>, vector<2x1xf32>,
    return
  }
  func.func @transform_0(%arg0: i32) -> (i32, i32) {
    %c0_i32 = arith.constant 0 : i32
    %c0_i32_0 = arith.constant 0 : i32
    %c0_i32_1 = arith.constant 0 : i32
    return %c0_i32, %c0_i32_0 : i32, i32
  }
  func.func @transform_1(%arg0: i32) -> (i32, i32, i32) {
    %c0_i32 = arith.constant 0 : i32
    %c0_i32_0 = arith.constant 0 : i32
    %c0_i32_1 = arith.constant 0 : i32
    %c0_i32_2 = arith.constant 0 : i32
    return %c0_i32, %c0_i32_0, %c0_i32_1 : i32, i32, i32
  }
  func.func @transform_2(%arg0: i32) -> (i32, i32, i32) {
    %c0_i32 = arith.constant 0 : i32
    %c0_i32_0 = arith.constant 0 : i32
    %c0_i32_1 = arith.constant 0 : i32
    %c0_i32_2 = arith.constant 0 : i32
    return %c0_i32, %c0_i32_0, %c0_i32_1 : i32, i32, i32
  }
  func.func @transform_3(%arg0: i32) -> (i32, i32, i32) {
    %c0_i32 = arith.constant 0 : i32
    %c0_i32_0 = arith.constant 0 : i32
    %c0_i32_1 = arith.constant 0 : i32
    %c0_i32_2 = arith.constant 0 : i32
    return %c0_i32, %c0_i32_0, %c0_i32_1 : i32, i32, i32
  }
  func.func @transform_4(%arg0: i32) -> (i32, i32, i32) {
    %c0_i32 = arith.constant 0 : i32
    %c0_i32_0 = arith.constant 0 : i32
    %c0_i32_1 = arith.constant 0 : i32
    %c0_i32_2 = arith.constant 0 : i32
    return %c0_i32, %c0_i32_0, %c0_i32_1 : i32, i32, i32
  }
  func.func @transform_5(%arg0: i32) -> (i32, i32, i32) {
    %c0_i32 = arith.constant 0 : i32
    %c0_i32_0 = arith.constant 0 : i32
    %c0_i32_1 = arith.constant 0 : i32
    %c0_i32_2 = arith.constant 0 : i32
    return %c0_i32, %c0_i32_0, %c0_i32_1 : i32, i32, i32
  }
  func.func @transform_6(%arg0: i32) -> (i32, i32, i32) {
    %c0_i32 = arith.constant 0 : i32
    %c0_i32_0 = arith.constant 0 : i32
    %c0_i32_1 = arith.constant 0 : i32
    %c0_i32_2 = arith.constant 0 : i32
    return %c0_i32, %c0_i32_0, %c0_i32_1 : i32, i32, i32
  }
  func.func @transform_7(%arg0: i32) -> (i32, i32, i32) {
    %c0_i32 = arith.constant 0 : i32
    %c0_i32_0 = arith.constant 0 : i32
    %c0_i32_1 = arith.constant 0 : i32
    %c0_i32_2 = arith.constant 0 : i32
    return %c0_i32, %c0_i32_0, %c0_i32_1 : i32, i32, i32
  }
  func.func @transform_8(%arg0: i32) -> (i32, i32, i32) {
    %c0_i32 = arith.constant 0 : i32
    %c0_i32_0 = arith.constant 0 : i32
    %c0_i32_1 = arith.constant 0 : i32
    %c0_i32_2 = arith.constant 0 : i32
    return %c0_i32, %c0_i32_0, %c0_i32_1 : i32, i32, i32
  }
  func.func @transform_9(%arg0: i32) -> (i32, i32) {
    %c0_i32 = arith.constant 0 : i32
    %c0_i32_0 = arith.constant 0 : i32
    %c0_i32_1 = arith.constant 0 : i32
    return %c0_i32, %c0_i32_0 : i32, i32
  }
}

</mosaic_0001>

<bundles_post_ra>
// kernel: tpu_custom_call.1
= control target key start
LH: loop header
LB: loop body
LE: loop exit
PB: predicated region body
PF: predicated region fallthrough
CT: control target
= control target key end

     0   :  { %14 = vsyncpa [#allocation3], 0  ;;  %s5248_s0 = inlined_call_operand.hbm [shape: f32[64,128], index: 0, kind: input, shape index: {}]   ;;  %s5249_s1 = inlined_call_operand.hbm [shape: f32[4,32,64], index: 1, kind: input, shape index: {}]   ;;  %s5250_s2 = inlined_call_operand.vmem [shape: f32[4,128,128], index: 2, kind: input, shape index: {}]   ;;  %s5251_s3 = inlined_call_operand.hbm [shape: f32[4,16,32], index: 3, kind: input, shape index: {}]   ;;  %s5252_s4 = inlined_call_operand.hbm [shape: f32[4,128,128], index: 4, kind: input, shape index: {}]   ;;  %s5253_s5 = inlined_call_operand.hbm [shape: f32[4,8,16], index: 5, kind: input, shape index: {}]   ;;  %s5254_s6 = inlined_call_operand.hbm [shape: f32[4,128,128], index: 6, kind: input, shape index: {}]   ;;  %s5255_s7 = inlined_call_operand.vmem [shape: f32[4,2,8], index: 7, kind: input, shape index: {}]   ;;  %s5256_s8 = inlined_call_operand.vmem [shape: f32[4,128,1], index: 8, kind: input, shape index: {}]   ;;  %s5257_s9 = inlined_call_operand.vmem [shape: f32[2,1], index: 9, kind: output, shape index: {}]  }
   0x1   :  { %15 = vsyncpa [#allocation5], 0 }
   0x2   :  { %16 = vsyncpa [#allocation8], 0 }
   0x3   :  { %17 = vsyncpa [#allocation11], 0  ;;  %s4393_s30 = smov [#allocation4]   ;;  %s4394_s11 = smov [#allocation7]  }
   0x4   :  { %s35_s10 = sshll.u32 %s4393_s30, 4  ;;  %s61_s12 = sshll.u32 %s4394_s11, 4  ;;  %s36_s10 = int_to_ptr.vmem [resolvable:$true] %s35_s10  ;;  %s62_s12 = int_to_ptr.vmem [resolvable:$true] %s61_s12 }
   0x5   :  { %s4273_s13 = scalar_lea.vmem %s36_s10, 2048  ;;  %p4278_p1 = scmp.lt.s32.totalorder %s36_s10, %s36_s10 }
   0x6   :  { %p4274_p0 = scmp.ne.s32.totalorder %s36_s10, %s4273_s13  ;;  %p4279_p2 = scmp.lt.s32.totalorder %s4273_s13, %s4273_s13 }
   0x8   :  { %p4280_p3 = por %p4279_p2, %p4278_p1 }
   0xa   :  { %p4281_p4 = pnand %p4280_p3, %p4274_p0 }
   0xc   :  { %4284 = shalt.err (!%p4281_p4)
}
   0xd   :  { %s4395_s14 = smov 128   ;;  %s4396_s15 = smov 8  }
   0xe   :  { %41 = dma.hbm_to_vmem [thread:$0]  %s5249_s1, 2048, %s36_s10, [#allocation5], %s4395_s14, %s4395_s14, %s4396_s15  }
   0xf   :  { %s4293_s18 = scalar_lea.vmem %s62_s12, 8192  ;;  %p4298_p6 = scmp.lt.s32.totalorder %s62_s12, %s62_s12 }
  0x10   :  { %p4294_p5 = scmp.ne.s32.totalorder %s62_s12, %s4293_s18  ;;  %p4299_p7 = scmp.lt.s32.totalorder %s4293_s18, %s4293_s18 }
  0x12   :  { %p4300_p8 = por %p4299_p7, %p4298_p6 }
  0x14   :  { %p4301_p9 = pnand %p4300_p8, %p4294_p5 }
  0x16   :  { %4304 = shalt.err (!%p4301_p9)
}
  0x17   :  { %67 = dma.hbm_to_vmem [thread:$0]  %s5252_s4, 8192, %s62_s12, [#allocation8], %s4395_s14, %s4395_s14, %s4396_s15  }
  0x18   :  { %s4397_s21 = smov [#allocation2]   ;;  %s4398_s23 = smov [#allocation6]  }
  0x19   :  { %s23_s22 = sshll.u32 %s4397_s21, 4  ;;  %s49_s24 = sshll.u32 %s4398_s23, 4  ;;  %s24_s22 = int_to_ptr.vmem [resolvable:$true] %s23_s22  ;;  %s50_s24 = int_to_ptr.vmem [resolvable:$true] %s49_s24 }
  0x1a   :  { %s4313_s1 = scalar_lea.vmem %s24_s22, 1024  ;;  %p4318_p11 = scmp.lt.s32.totalorder %s24_s22, %s24_s22 }
  0x1b   :  { %p4314_p10 = scmp.ne.s32.totalorder %s24_s22, %s4313_s1  ;;  %p4319_p12 = scmp.lt.s32.totalorder %s4313_s1, %s4313_s1 }
  0x1d   :  { %p4320_p13 = por %p4319_p12, %p4318_p11 }
  0x1f   :  { %p4321_p0 = pnand %p4320_p13, %p4314_p10 }
  0x21   :  { %4324 = shalt.err (!%p4321_p0)
}
  0x22   :  { %29 = dma.hbm_to_vmem [thread:$0]  %s5248_s0, 1024, %s24_s22, [#allocation3], %s4395_s14, %s4395_s14, %s4396_s15  }
  0x23   :  { %s4333_s4 = scalar_lea.vmem %s50_s24, 1024  ;;  %p4338_p2 = scmp.lt.s32.totalorder %s50_s24, %s50_s24 }
  0x24   :  { %p4334_p1 = scmp.ne.s32.totalorder %s50_s24, %s4333_s4  ;;  %p4339_p3 = scmp.lt.s32.totalorder %s4333_s4, %s4333_s4 }
  0x26   :  { %p4340_p4 = por %p4339_p3, %p4338_p2 }
  0x28   :  { %p4341_p5 = pnand %p4340_p4, %p4334_p1 }
  0x2a   :  { %4344 = shalt.err (!%p4341_p5)
}
  0x2b   :  { %55 = dma.hbm_to_vmem [thread:$0]  %s5251_s3, 1024, %s50_s24, [#allocation5], %s4395_s14, %s4395_s14, %s4396_s15  }
  0x2c   :  { %s4399_s29 = smov [#allocation9]   ;;  %s4400_s10 = smov [#allocation10]  }
  0x2d   :  { %s73_s30 = sshll.u32 %s4399_s29, 4  ;;  %s85_s11 = sshll.u32 %s4400_s10, 4  ;;  %s74_s30 = int_to_ptr.vmem [resolvable:$true] %s73_s30  ;;  %s86_s11 = int_to_ptr.vmem [resolvable:$true] %s85_s11 }
  0x2e   :  { %s4353_s0 = scalar_lea.vmem %s74_s30, 512  ;;  %p4358_p7 = scmp.lt.s32.totalorder %s74_s30, %s74_s30 }
  0x2f   :  { %p4354_p6 = scmp.ne.s32.totalorder %s74_s30, %s4353_s0  ;;  %p4359_p8 = scmp.lt.s32.totalorder %s4353_s0, %s4353_s0 }
  0x31   :  { %p4360_p9 = por %p4359_p8, %p4358_p7 }
  0x33   :  { %p4361_p10 = pnand %p4360_p9, %p4354_p6 }
  0x35   :  { %4364 = shalt.err (!%p4361_p10)
}
  0x36   :  { %79 = dma.hbm_to_vmem [thread:$0]  %s5253_s5, 512, %s74_s30, [#allocation8], %s4395_s14, %s4395_s14, %s4396_s15  }
  0x37   :  { %s4373_s3 = scalar_lea.vmem %s86_s11, 8192  ;;  %p4378_p12 = scmp.lt.s32.totalorder %s86_s11, %s86_s11 }
  0x38   :  { %p4374_p11 = scmp.ne.s32.totalorder %s86_s11, %s4373_s3  ;;  %p4379_p13 = scmp.lt.s32.totalorder %s4373_s3, %s4373_s3 }
  0x3a   :  { %p4380_p0 = por %p4379_p13, %p4378_p12 }
  0x3c   :  { %p4381_p1 = pnand %p4380_p0, %p4374_p11 }
  0x3e   :  { %4384 = shalt.err (!%p4381_p1)
}
  0x3f   :  { %91 = dma.hbm_to_vmem [thread:$0]  %s5254_s6, 8192, %s86_s11, [#allocation11], %s4395_s14, %s4395_s14, %s4396_s15  }
  0x40   :  { %4385 = dma.done.wait [#allocation3], 1024  }
  0x41   :  { %4386 = vsyncadd [#allocation3], 4294966272 }
  0x42   :  { %4387 = dma.done.wait [#allocation5], 3072  }
  0x43   :  { %4388 = vsyncadd [#allocation5], 4294964224 }
  0x44   :  { %4389 = dma.done.wait [#allocation8], 8704  }
  0x45   :  { %4390 = vsyncadd [#allocation8], 4294958592 }
  0x46   :  { %4391 = dma.done.wait [#allocation11], 8192  }
  0x47   :  { %4392 = vsyncadd [#allocation11], 4294959104  ;;  %v4489_v0 = vld [vmem:[#allocation2 + $0x38] sm:$0xff]  ;;  %v4491_v1 = vld [vmem:[#allocation2 + $0x30] sm:$0xff]  ;;  %vm126_vm0 = vcmask 523264   ;;  %vm959_vm1 = vcmask 261120  }
  0x48   :  { %3499 = vmatprep.subr.mxu0 %v4489_v0  ;;  %3521 = vmatprep.subr.mxu1 %v4489_v0  ;;  %v4497_v2 = vld [vmem:[#allocation2 + $0x28] sm:$0xff]  ;;  %v4503_v3 = vld [vmem:[#allocation2 + $0x20] sm:$0xff]  ;;  %v4509_v4 = vld [vmem:[#allocation2 + $0x18] sm:$0xff]  ;;  %vm4402_vm6 = vmmov 0   ;;  %vm1671_vm9 = vcmask 130048   ;;  %vm2323_vm11 = vcmask 64512  }
  0x49   :  { %3500 = vmatpush3.msra.mxu0 %v4489_v0  ;;  %3522 = vmatpush3.msra.mxu1 %v4489_v0  ;;  %v4515_v5 = vld [vmem:[#allocation2 + $0x10] sm:$0xff]  ;;  %v4521_v6 = vld [vmem:[#allocation2 + $0x8] sm:$0xff]  ;;  %v4527_v7 = vld [vmem:[#allocation2] sm:$0xff]  ;;  %vm2977_vm12 = vcmask 1024  }
  0x4a   :  { %3501 = vmatprep.subr.mxu0 %v4491_v1  ;;  %3523 = vmatprep.subr.mxu1 %v4491_v1  ;;  %v122_v8 = vld [vmem:[#allocation4] sm:$0xff]  ;;  %v123_v10 = vld [vmem:[#allocation4 + $0x8] sm:$0xff]  ;;  %v124_v12 = vld [vmem:[#allocation4 + $0x10] sm:$0xff] }
  0x4b   :  { %3502 = vmatpush3.msra.mxu0 %v4491_v1  ;;  %3524 = vmatpush3.msra.mxu1 %v4491_v1  ;;  %v241_v9 = vld [vmem:[#allocation4 + $0x20] sm:$0xff]  ;;  %v242_v11 = vld [vmem:[#allocation4 + $0x28] sm:$0xff]  ;;  %v243_v13 = vld [vmem:[#allocation4 + $0x30] sm:$0xff] }
  0x4c   :  { %3503 = vmatprep.subr.mxu0 %v4497_v2  ;;  %3525 = vmatprep.subr.mxu1 %v4497_v2  ;;  %v3010_v14 = vld [vmem:[%s5250_s2 + $0xf8] sm:$0xff]  ;;  %v3009_v18 = vld [vmem:[%s5250_s2 + $0xf0] sm:$0xff]  ;;  %v3008_v20 = vld [vmem:[%s5250_s2 + $0xe8] sm:$0xff] }
  0x4d   :  { %3504 = vmatpush3.msra.mxu0 %v4497_v2  ;;  %3526 = vmatpush3.msra.mxu1 %v4497_v2  ;;  %v239_v15 = vld [vmem:[%s5250_s2 + $0x78] sm:$0xff]  ;;  %v238_v19 = vld [vmem:[%s5250_s2 + $0x70] sm:$0xff]  ;;  %v237_v21 = vld [vmem:[%s5250_s2 + $0x68] sm:$0xff] }
  0x4e   :  { %3505 = vmatprep.subr.mxu0 %v4503_v3  ;;  %3527 = vmatprep.subr.mxu1 %v4503_v3  ;;  %v125_v16 = vld [vmem:[#allocation4 + $0x18] sm:$0xff]  ;;  %v3007_v22 = vld [vmem:[%s5250_s2 + $0xe0] sm:$0xff]  ;;  %v3005_v26 = vld [vmem:[%s5250_s2 + $0xd0] sm:$0xff] }
  0x4f   :  { %3506 = vmatpush3.msra.mxu0 %v4503_v3  ;;  %3528 = vmatpush3.msra.mxu1 %v4503_v3  ;;  %v244_v17 = vld [vmem:[#allocation4 + $0x38] sm:$0xff]  ;;  %v236_v23 = vld [vmem:[%s5250_s2 + $0x60] sm:$0xff]  ;;  %v234_v27 = vld [vmem:[%s5250_s2 + $0x50] sm:$0xff] }
  0x50   :  { %3507 = vmatprep.subr.mxu0 %v4509_v4  ;;  %3529 = vmatprep.subr.mxu1 %v4509_v4  ;;  %v3006_v24 = vld [vmem:[%s5250_s2 + $0xd8] sm:$0xff]  ;;  %v3004_v28 = vld [vmem:[%s5250_s2 + $0xc8] sm:$0xff]  ;;  %v3003_v30 = vld [vmem:[%s5250_s2 + $0xc0] sm:$0xff] }
  0x51   :  { %3508 = vmatpush3.msra.mxu0 %v4509_v4  ;;  %3530 = vmatpush3.msra.mxu1 %v4509_v4  ;;  %v235_v25 = vld [vmem:[%s5250_s2 + $0x58] sm:$0xff]  ;;  %v233_v29 = vld [vmem:[%s5250_s2 + $0x48] sm:$0xff]  ;;  %v232_v31 = vld [vmem:[%s5250_s2 + $0x40] sm:$0xff] }
  0x52   :  { %3509 = vmatprep.subr.mxu0 %v4515_v5  ;;  %3531 = vmatprep.subr.mxu1 %v4515_v5  ;;  %v3002_v32 = vld [vmem:[%s5250_s2 + $0xb8] sm:$0xff]  ;;  %v3001_v34 = vld [vmem:[%s5250_s2 + $0xb0] sm:$0xff]  ;;  %v3000_v36 = vld [vmem:[%s5250_s2 + $0xa8] sm:$0xff] }
  0x53   :  { %3510 = vmatpush3.msra.mxu0 %v4515_v5  ;;  %3532 = vmatpush3.msra.mxu1 %v4515_v5  ;;  %v231_v33 = vld [vmem:[%s5250_s2 + $0x38] sm:$0xff]  ;;  %v230_v35 = vld [vmem:[%s5250_s2 + $0x30] sm:$0xff]  ;;  %v229_v37 = vld [vmem:[%s5250_s2 + $0x28] sm:$0xff] }
  0x54   :  { %3511 = vmatprep.subr.mxu0 %v4521_v6  ;;  %3533 = vmatprep.subr.mxu1 %v4521_v6  ;;  %v2999_v38 = vld [vmem:[%s5250_s2 + $0xa0] sm:$0xff]  ;;  %v2998_v40 = vld [vmem:[%s5250_s2 + $0x98] sm:$0xff]  ;;  %v2997_v42 = vld [vmem:[%s5250_s2 + $0x90] sm:$0xff] }
  0x55   :  { %3512 = vmatpush3.msra.mxu0 %v4521_v6  ;;  %3534 = vmatpush3.msra.mxu1 %v4521_v6  ;;  %v228_v39 = vld [vmem:[%s5250_s2 + $0x20] sm:$0xff]  ;;  %v227_v41 = vld [vmem:[%s5250_s2 + $0x18] sm:$0xff]  ;;  %v226_v43 = vld [vmem:[%s5250_s2 + $0x10] sm:$0xff] }
  0x56   :  { %3513 = vmatprep.subr.mxu0 %v4527_v7  ;;  %3535 = vmatprep.subr.mxu1 %v4527_v7  ;;  %v2996_v44 = vld [vmem:[%s5250_s2 + $0x88] sm:$0xff]  ;;  %v2995_v46 = vld [vmem:[%s5250_s2 + $0x80] sm:$0xff]  ;;  %v3030_v48 = vld [vmem:[%s5250_s2 + $0x178] sm:$0xff] }
  0x57   :  { %3514 = vmatpush3.msra.mxu0 %v4527_v7  ;;  %3515 = vmatprep.mubr.msk.f32.mxu0 %vm126_vm0, %v122_v8  ;;  %v225_v45 = vld [vmem:[%s5250_s2 + $0x8] sm:$0xff]  ;;  %v224_v47 = vld [vmem:[%s5250_s2] sm:$0xff]  ;;  %v3029_v53 = vld [vmem:[%s5250_s2 + $0x170] sm:$0xff] }
  0x58   :  { %3536 = vmatpush3.msra.mxu1 %v4527_v7  ;;  %3537 = vmatprep.mubr.msk.f32.mxu1 %vm126_vm0, %v241_v9  ;;  %v530_v58 = vld [vmem:[#allocation4 + $0x40] sm:$0xff]  ;;  %v3028_v59 = vld [vmem:[%s5250_s2 + $0x168] sm:$0xff]  ;;  %v3026_v61 = vld [vmem:[%s5250_s2 + $0x158] sm:$0xff] }
  0x59   :  { %3516 = vmatmul.mubr.msk.f32.vlgmr.msra.gmra.mxu0 %vm126_vm0, %v123_v10  ;;  %3538 = vmatmul.mubr.msk.f32.vlgmr.msra.gmra.mxu1 %vm126_vm0, %v242_v11  ;;  %v3027_v60 = vld [vmem:[%s5250_s2 + $0x160] sm:$0xff]  ;;  %v3025_v62 = vld [vmem:[%s5250_s2 + $0x150] sm:$0xff]  ;;  %v531_v63 = vld [vmem:[#allocation4 + $0x48] sm:$0xff] }
  0x5a   :  { %3518 = vmatprep.mubr.msk.f32.mxu0 %vm126_vm0, %v124_v12  ;;  %3540 = vmatprep.mubr.msk.f32.mxu1 %vm126_vm0, %v243_v13  ;;  %v532_v8 = vld [vmem:[#allocation4 + $0x50] sm:$0xff]  ;;  %v3024_v9 = vld [vmem:[%s5250_s2 + $0x148] sm:$0xff]  ;;  %v533_v10 = vld [vmem:[#allocation4 + $0x58] sm:$0xff] }
  0x5b   :  { %3543 = vmatprep.subr.mxu0 %v3010_v14  ;;  %3581 = vmatprep.subr.mxu1 %v239_v15  ;;  %v738_v11 = vld [vmem:[#allocation4 + $0x60] sm:$0xff]  ;;  %v3020_v12 = vld [vmem:[%s5250_s2 + $0x128] sm:$0xff] }
  0x5c   :  { %3544 = vmatpush3.msra.mxu0 %v3010_v14  ;;  %3582 = vmatpush3.msra.mxu1 %v239_v15  ;;  %v3048_v13 = vld [vmem:[%s5250_s2 + $0x1e8] sm:$0xff]  ;;  %v3019_v14 = vld [vmem:[%s5250_s2 + $0x120] sm:$0xff] }
  0x5d   :  { %3519 = vmatmul.mubr.msk.f32.gmra.mxu0 %vm126_vm0, %v125_v16  ;;  %3541 = vmatmul.mubr.msk.f32.gmra.mxu1 %vm126_vm0, %v244_v17  ;;  %v3047_v15 = vld [vmem:[%s5250_s2 + $0x1e0] sm:$0xff]  ;;  %v3018_v16 = vld [vmem:[%s5250_s2 + $0x118] sm:$0xff] }
  0x5e   :  { %3545 = vmatprep.subr.mxu0 %v3009_v18  ;;  %3583 = vmatprep.subr.mxu1 %v238_v19  ;;  %v3046_v17 = vld [vmem:[%s5250_s2 + $0x1d8] sm:$0xff] }
  0x5f   :  { %3546 = vmatpush3.msra.mxu0 %v3009_v18  ;;  %3584 = vmatpush3.msra.mxu1 %v238_v19  ;;  %v3017_v18 = vld [vmem:[%s5250_s2 + $0x110] sm:$0xff] }
  0x60   :  { %3547 = vmatprep.subr.mxu0 %v3008_v20  ;;  %3585 = vmatprep.subr.mxu1 %v237_v21  ;;  %v3045_v19 = vld [vmem:[%s5250_s2 + $0x1d0] sm:$0xff] }
  0x61   :  { %3548 = vmatpush3.msra.mxu0 %v3008_v20  ;;  %3586 = vmatpush3.msra.mxu1 %v237_v21  ;;  %v3016_v20 = vld [vmem:[%s5250_s2 + $0x108] sm:$0xff] }
  0x62   :  { %3549 = vmatprep.subr.mxu0 %v3007_v22  ;;  %3587 = vmatprep.subr.mxu1 %v236_v23  ;;  %v3044_v21 = vld [vmem:[%s5250_s2 + $0x1c8] sm:$0xff] }
  0x63   :  { %3550 = vmatpush3.msra.mxu0 %v3007_v22  ;;  %3588 = vmatpush3.msra.mxu1 %v236_v23  ;;  %v3015_v22 = vld [vmem:[%s5250_s2 + $0x100] sm:$0xff] }
  0x64   :  { %3551 = vmatprep.subr.mxu0 %v3006_v24  ;;  %3589 = vmatprep.subr.mxu1 %v235_v25  ;;  %v3043_v23 = vld [vmem:[%s5250_s2 + $0x1c0] sm:$0xff] }
  0x65   :  { %3552 = vmatpush3.msra.mxu0 %v3006_v24  ;;  %3590 = vmatpush3.msra.mxu1 %v235_v25  ;;  %v3042_v24 = vld [vmem:[%s5250_s2 + $0x1b8] sm:$0xff]  ;;  %v3041_v25 = vld [vmem:[%s5250_s2 + $0x1b0] sm:$0xff] }
  0x66   :  { %3553 = vmatprep.subr.mxu0 %v3005_v26  ;;  %3591 = vmatprep.subr.mxu1 %v234_v27 }
  0x67   :  { %3554 = vmatpush3.msra.mxu0 %v3005_v26  ;;  %3592 = vmatpush3.msra.mxu1 %v234_v27  ;;  %v3040_v26 = vld [vmem:[%s5250_s2 + $0x1a8] sm:$0xff]  ;;  %v3039_v27 = vld [vmem:[%s5250_s2 + $0x1a0] sm:$0xff] }
  0x68   :  { %3555 = vmatprep.subr.mxu0 %v3004_v28  ;;  %3593 = vmatprep.subr.mxu1 %v233_v29 }
  0x69   :  { %3556 = vmatpush3.msra.mxu0 %v3004_v28  ;;  %3594 = vmatpush3.msra.mxu1 %v233_v29  ;;  %v3038_v28 = vld [vmem:[%s5250_s2 + $0x198] sm:$0xff]  ;;  %v3037_v29 = vld [vmem:[%s5250_s2 + $0x190] sm:$0xff] }
  0x6a   :  { %3557 = vmatprep.subr.mxu0 %v3003_v30  ;;  %3595 = vmatprep.subr.mxu1 %v232_v31 }
  0x6b   :  { %3558 = vmatpush3.msra.mxu0 %v3003_v30  ;;  %3596 = vmatpush3.msra.mxu1 %v232_v31  ;;  %v3036_v30 = vld [vmem:[%s5250_s2 + $0x188] sm:$0xff]  ;;  %v3035_v31 = vld [vmem:[%s5250_s2 + $0x180] sm:$0xff] }
  0x6c   :  { %3559 = vmatprep.subr.mxu0 %v3002_v32  ;;  %3597 = vmatprep.subr.mxu1 %v231_v33 }
  0x6d   :  { %3560 = vmatpush3.msra.mxu0 %v3002_v32  ;;  %3598 = vmatpush3.msra.mxu1 %v231_v33  ;;  %v1056_v32 = vld [vmem:[#allocation7 + $0x78] sm:$0xff] }
  0x6e   :  { %3561 = vmatprep.subr.mxu0 %v3001_v34  ;;  %3599 = vmatprep.subr.mxu1 %v230_v35 }
  0x6f   :  { %3562 = vmatpush3.msra.mxu0 %v3001_v34  ;;  %3600 = vmatpush3.msra.mxu1 %v230_v35 }
  0x70   :  { %3563 = vmatprep.subr.mxu0 %v3000_v36  ;;  %3601 = vmatprep.subr.mxu1 %v229_v37 }
  0x71   :  { %3564 = vmatpush3.msra.mxu0 %v3000_v36  ;;  %3602 = vmatpush3.msra.mxu1 %v229_v37 }
  0x72   :  { %3565 = vmatprep.subr.mxu0 %v2999_v38  ;;  %3603 = vmatprep.subr.mxu1 %v228_v39 }
  0x73   :  { %3566 = vmatpush3.msra.mxu0 %v2999_v38  ;;  %3604 = vmatpush3.msra.mxu1 %v228_v39 }
  0x74   :  { %3567 = vmatprep.subr.mxu0 %v2998_v40  ;;  %3605 = vmatprep.subr.mxu1 %v227_v41 }
  0x75   :  { %3568 = vmatpush3.msra.mxu0 %v2998_v40  ;;  %3606 = vmatpush3.msra.mxu1 %v227_v41 }
  0x76   :  { %3569 = vmatprep.subr.mxu0 %v2997_v42  ;;  %3607 = vmatprep.subr.mxu1 %v226_v43 }
  0x77   :  { %3570 = vmatpush3.msra.mxu0 %v2997_v42  ;;  %3608 = vmatpush3.msra.mxu1 %v226_v43  ;;  %v1055_v43 = vld [vmem:[#allocation7 + $0x70] sm:$0xff] }
  0x78   :  { %3571 = vmatprep.subr.mxu0 %v2996_v44  ;;  %3609 = vmatprep.subr.mxu1 %v225_v45 }
  0x79   :  { %3572 = vmatpush3.msra.mxu0 %v2996_v44  ;;  %3610 = vmatpush3.msra.mxu1 %v225_v45  ;;  %v1054_v45 = vld [vmem:[#allocation7 + $0x68] sm:$0xff] }
  0x7a   :  { %3573 = vmatprep.subr.mxu0 %v2995_v46  ;;  %3611 = vmatprep.subr.mxu1 %v224_v47 }
  0x7b   :  { %3574 = vmatpush3.msra.mxu0 %v2995_v46  ;;  %3612 = vmatpush3.msra.mxu1 %v224_v47  ;;  %v1053_v47 = vld [vmem:[#allocation7 + $0x60] sm:$0xff] }
  0x7c   :  { %3619 = vmatprep.subr.mxu0 %v4489_v0  ;;  %3641 = vmatprep.subr.mxu1 %v3030_v48 }
 0x119   :  { %v3517_v49 = vpop.f32.mrf.mxu0  ;;  %v3539_v50 = vpop.f32.mrf.mxu1 }
 0x11b   :  { %v205_v51 = vpop.f32.mrf.mxu0  ;;  %v323_v52 = vpop.f32.mrf.mxu1 }
 0x11c   :  { %3575 = vmatprep.mubr.f32.mxu0 %v323_v52  ;;  %3613 = vmatprep.mubr.f32.mxu1 %v205_v51  ;;  %v1049_v51 = vld [vmem:[#allocation7 + $0x40] sm:$0xff]  ;;  %v1048_v52 = vld [vmem:[#allocation7 + $0x38] sm:$0xff] }
 0x11d   :  { %3576 = vmatmul.mubr.f32.vlgmr.msra.gmra.mxu0 %v3539_v50  ;;  %3614 = vmatmul.mubr.f32.vlgmr.msra.gmra.mxu1 %v3517_v49  ;;  %v3520_v54 = vpop.f32.mrf.mxu0  ;;  %v3542_v55 = vpop.f32.mrf.mxu1  ;;  %v1051_v49 = vld [vmem:[#allocation7 + $0x50] sm:$0xff]  ;;  %v1050_v50 = vld [vmem:[#allocation7 + $0x48] sm:$0xff] }
 0x11e   :  { %3620 = vmatpush3.msra.mxu0 %v4489_v0  ;;  %3642 = vmatpush3.msra.mxu1 %v3030_v48  ;;  %v1052_v48 = vld [vmem:[#allocation7 + $0x58] sm:$0xff] }
 0x11f   :  { %3621 = vmatprep.subr.mxu0 %v4491_v1  ;;  %v215_v56 = vpop.f32.mrf.mxu0  ;;  %v333_v57 = vpop.f32.mrf.mxu1  ;;  %3643 = vmatprep.subr.mxu1 %v3029_v53 }
 0x120   :  { %3622 = vmatpush3.msra.mxu0 %v4491_v1  ;;  %3578 = vmatprep.mubr.f32.mxu0 %v333_v57  ;;  %v1043_v57 = vld [vmem:[#allocation7 + $0x10] sm:$0xff] }
 0x121   :  { %3623 = vmatprep.subr.mxu0 %v4497_v2  ;;  %3616 = vmatprep.mubr.f32.mxu1 %v215_v56  ;;  %v1044_v56 = vld [vmem:[#allocation7 + $0x18] sm:$0xff] }
 0x122   :  { %3624 = vmatpush3.msra.mxu0 %v4497_v2  ;;  %3617 = vmatmul.mubr.f32.gmra.mxu1 %v3520_v54  ;;  %v1046_v54 = vld [vmem:[#allocation7 + $0x28] sm:$0xff] }
 0x123   :  { %3625 = vmatprep.subr.mxu0 %v4503_v3  ;;  %3579 = vmatmul.mubr.f32.gmra.mxu0 %v3542_v55  ;;  %v1045_v55 = vld [vmem:[#allocation7 + $0x20] sm:$0xff] }
 0x124   :  { %3626 = vmatpush3.msra.mxu0 %v4503_v3  ;;  %3635 = vmatprep.mubr.msk.f32.mxu0 %vm126_vm0, %v530_v58  ;;  %v1042_v58 = vld [vmem:[#allocation7 + $0x8] sm:$0xff] }
 0x125   :  { %3627 = vmatprep.subr.mxu0 %v4509_v4  ;;  %3644 = vmatpush3.msra.mxu1 %v3029_v53  ;;  %v1047_v53 = vld [vmem:[#allocation7 + $0x30] sm:$0xff] }
 0x126   :  { %3628 = vmatpush3.msra.mxu0 %v4509_v4  ;;  %3645 = vmatprep.subr.mxu1 %v3028_v59 }
 0x127   :  { %3629 = vmatprep.subr.mxu0 %v4515_v5  ;;  %3646 = vmatpush3.msra.mxu1 %v3028_v59  ;;  %v1041_v59 = vld [vmem:[#allocation7] sm:$0xff] }
 0x128   :  { %3630 = vmatpush3.msra.mxu0 %v4515_v5  ;;  %3647 = vmatprep.subr.mxu1 %v3027_v60 }
 0x129   :  { %3631 = vmatprep.subr.mxu0 %v4521_v6  ;;  %3648 = vmatpush3.msra.mxu1 %v3027_v60  ;;  %v957_v60 = vld [vmem:[#allocation6] sm:$0xff] }
 0x12a   :  { %3632 = vmatpush3.msra.mxu0 %v4521_v6  ;;  %3649 = vmatprep.subr.mxu1 %v3026_v61 }
 0x12b   :  { %3633 = vmatprep.subr.mxu0 %v4527_v7  ;;  %3650 = vmatpush3.msra.mxu1 %v3026_v61 }
 0x12c   :  { %3634 = vmatpush3.msra.mxu0 %v4527_v7  ;;  %3651 = vmatprep.subr.mxu1 %v3025_v62 }
 0x12d   :  { %3636 = vmatmul.mubr.msk.f32.vlgmr.msra.gmra.mxu0 %vm126_vm0, %v531_v63  ;;  %3679 = vmatprep.subr.mxu0 %v4489_v0 }
 0x12e   :  { %3680 = vmatpush3.msra.mxu0 %v4489_v0  ;;  %3638 = vmatprep.mubr.msk.f32.mxu0 %vm126_vm0, %v532_v8  ;;  %v739_v0 = vld [vmem:[#allocation4 + $0x68] sm:$0xff] }
 0x12f   :  { %3681 = vmatprep.subr.mxu0 %v4491_v1  ;;  %3652 = vmatpush3.msra.mxu1 %v3025_v62 }
 0x130   :  { %3682 = vmatpush3.msra.mxu0 %v4491_v1  ;;  %3653 = vmatprep.subr.mxu1 %v3024_v9  ;;  %v740_v1 = vld [vmem:[#allocation4 + $0x70] sm:$0xff] }
 0x131   :  { %3639 = vmatmul.mubr.msk.f32.gmra.mxu0 %vm126_vm0, %v533_v10  ;;  %3683 = vmatprep.subr.mxu0 %v4497_v2 }
 0x132   :  { %3684 = vmatpush3.msra.mxu0 %v4497_v2  ;;  %3695 = vmatprep.mubr.msk.f32.mxu0 %vm126_vm0, %v738_v11  ;;  %v741_v2 = vld [vmem:[#allocation4 + $0x78] sm:$0xff] }
 0x133   :  { %3685 = vmatprep.subr.mxu0 %v4503_v3  ;;  %3654 = vmatpush3.msra.mxu1 %v3024_v9 }
 0x134   :  { %3686 = vmatpush3.msra.mxu0 %v4503_v3  ;;  %v3023_v3 = vld [vmem:[%s5250_s2 + $0x140] sm:$0xff] }
 0x135   :  { %3687 = vmatprep.subr.mxu0 %v4509_v4  ;;  %3655 = vmatprep.subr.mxu1 %v3023_v3 }
 0x136   :  { %3688 = vmatpush3.msra.mxu0 %v4509_v4  ;;  %3656 = vmatpush3.msra.mxu1 %v3023_v3  ;;  %v3022_v4 = vld [vmem:[%s5250_s2 + $0x138] sm:$0xff] }
 0x137   :  { %3689 = vmatprep.subr.mxu0 %v4515_v5  ;;  %3657 = vmatprep.subr.mxu1 %v3022_v4 }
 0x138   :  { %3690 = vmatpush3.msra.mxu0 %v4515_v5  ;;  %v3050_v5 = vld [vmem:[%s5250_s2 + $0x1f8] sm:$0xff]  ;;  %3658 = vmatpush3.msra.mxu1 %v3022_v4 }
 0x139   :  { %3691 = vmatprep.subr.mxu0 %v4521_v6 }
 0x13a   :  { %3692 = vmatpush3.msra.mxu0 %v4521_v6  ;;  %v3021_v6 = vld [vmem:[%s5250_s2 + $0x130] sm:$0xff] }
 0x13b   :  { %3693 = vmatprep.subr.mxu0 %v4527_v7  ;;  %3659 = vmatprep.subr.mxu1 %v3021_v6 }
 0x13c   :  { %3694 = vmatpush3.msra.mxu0 %v4527_v7  ;;  %v3049_v7 = vld [vmem:[%s5250_s2 + $0x1f0] sm:$0xff]  ;;  %3660 = vmatpush3.msra.mxu1 %v3021_v6 }
 0x13d   :  { %3696 = vmatmul.mubr.msk.f32.vlgmr.msra.gmra.mxu0 %vm126_vm0, %v739_v0  ;;  %3701 = vmatprep.subr.mxu0 %v3050_v5 }
 0x13e   :  { %3698 = vmatprep.mubr.msk.f32.mxu0 %vm126_vm0, %v740_v1  ;;  %3702 = vmatpush3.msra.mxu0 %v3050_v5 }
 0x13f   :  { %3703 = vmatprep.subr.mxu0 %v3049_v7  ;;  %3661 = vmatprep.subr.mxu1 %v3020_v12 }
 0x140   :  { %3704 = vmatpush3.msra.mxu0 %v3049_v7  ;;  %3662 = vmatpush3.msra.mxu1 %v3020_v12 }
 0x141   :  { %3699 = vmatmul.mubr.msk.f32.gmra.mxu0 %vm126_vm0, %v741_v2  ;;  %3705 = vmatprep.subr.mxu0 %v3048_v13 }
 0x142   :  { %3706 = vmatpush3.msra.mxu0 %v3048_v13  ;;  %3663 = vmatprep.subr.mxu1 %v3019_v14 }
 0x143   :  { %3707 = vmatprep.subr.mxu0 %v3047_v15  ;;  %3664 = vmatpush3.msra.mxu1 %v3019_v14 }
 0x144   :  { %3708 = vmatpush3.msra.mxu0 %v3047_v15  ;;  %3665 = vmatprep.subr.mxu1 %v3018_v16 }
 0x145   :  { %3709 = vmatprep.subr.mxu0 %v3046_v17  ;;  %3666 = vmatpush3.msra.mxu1 %v3018_v16 }
 0x146   :  { %3710 = vmatpush3.msra.mxu0 %v3046_v17  ;;  %3667 = vmatprep.subr.mxu1 %v3017_v18 }
 0x147   :  { %3711 = vmatprep.subr.mxu0 %v3045_v19  ;;  %3668 = vmatpush3.msra.mxu1 %v3017_v18 }
 0x148   :  { %3712 = vmatpush3.msra.mxu0 %v3045_v19  ;;  %3669 = vmatprep.subr.mxu1 %v3016_v20 }
 0x149   :  { %3713 = vmatprep.subr.mxu0 %v3044_v21  ;;  %3670 = vmatpush3.msra.mxu1 %v3016_v20 }
 0x14a   :  { %3714 = vmatpush3.msra.mxu0 %v3044_v21  ;;  %3671 = vmatprep.subr.mxu1 %v3015_v22 }
 0x14b   :  { %3715 = vmatprep.subr.mxu0 %v3043_v23  ;;  %3672 = vmatpush3.msra.mxu1 %v3015_v22 }
 0x14c   :  { %3716 = vmatpush3.msra.mxu0 %v3043_v23 }
 0x14d   :  { %3717 = vmatprep.subr.mxu0 %v3042_v24 }
 0x14e   :  { %3718 = vmatpush3.msra.mxu0 %v3042_v24 }
 0x14f   :  { %3719 = vmatprep.subr.mxu0 %v3041_v25 }
 0x150   :  { %3720 = vmatpush3.msra.mxu0 %v3041_v25 }
 0x151   :  { %3721 = vmatprep.subr.mxu0 %v3040_v26 }
 0x152   :  { %3722 = vmatpush3.msra.mxu0 %v3040_v26 }
 0x153   :  { %3723 = vmatprep.subr.mxu0 %v3039_v27 }
 0x154   :  { %3724 = vmatpush3.msra.mxu0 %v3039_v27 }
 0x155   :  { %3725 = vmatprep.subr.mxu0 %v3038_v28 }
 0x156   :  { %3726 = vmatpush3.msra.mxu0 %v3038_v28 }
 0x157   :  { %3727 = vmatprep.subr.mxu0 %v3037_v29 }
 0x158   :  { %3728 = vmatpush3.msra.mxu0 %v3037_v29  ;;  %v958_v29 = vld [vmem:[#allocation6 + $0x8] sm:$0xff] }
 0x159   :  { %3729 = vmatprep.subr.mxu0 %v3036_v30 }
 0x15a   :  { %3730 = vmatpush3.msra.mxu0 %v3036_v30  ;;  %v1058_v30 = vld [vmem:[#allocation6 + $0x10] sm:$0xff] }
 0x15b   :  { %3731 = vmatprep.subr.mxu0 %v3035_v31 }
 0x15c   :  { %3732 = vmatpush3.msra.mxu0 %v3035_v31  ;;  %v1059_v31 = vld [vmem:[#allocation6 + $0x18] sm:$0xff] }
 0x15d   :  { %3796 = vmatprep.subr.mxu0 %v1056_v32 }
 0x1dd   :  { %v4777_v33 = vpop.f32.mrf.mxu0  ;;  %v3615_v61 = vpop.f32.mrf.mxu1 }
 0x1de   :  { %v516_v1 = vadd.f32 %v3615_v61, %v4777_v33  ;;  %v1156_v33 = vld [vmem:[#allocation7 + $0xf0] sm:$0xff] }
 0x1df   :  { %v4779_v34 = vpop.f32.mrf.mxu0  ;;  %v510_v62 = vpop.f32.mrf.mxu1  ;;  %v1407_v61 = vld [vmem:[#allocation7 + $0x170] sm:$0xff] }
 0x1e0   :  { %v511_v5 = vadd.f32 %v510_v62, %v4779_v34  ;;  %v1155_v34 = vld [vmem:[#allocation7 + $0xe8] sm:$0xff]  ;;  %v1582_v62 = vld [vmem:[#allocation7 + $0x1d8] sm:$0xff] }
 0x1e2   :  { %v3618_v63 = vpop.f32.mrf.mxu1 }
 0x1e3   :  { %v4781_v35 = vpop.f32.mrf.mxu0 }
 0x1e4   :  { %v520_v8 = vpop.f32.mrf.mxu1  ;;  %v526_v2 = vadd.f32 %v3618_v63, %v4781_v35  ;;  %v1154_v35 = vld [vmem:[#allocation7 + $0xe0] sm:$0xff]  ;;  %v1406_v63 = vld [vmem:[#allocation7 + $0x168] sm:$0xff] }
 0x1e5   :  { %v4783_v36 = vpop.f32.mrf.mxu0 }
 0x1e6   :  { %v521_v6 = vadd.f32 %v520_v8, %v4783_v36  ;;  %v1153_v36 = vld [vmem:[#allocation7 + $0xd8] sm:$0xff]  ;;  %v1581_v8 = vld [vmem:[#allocation7 + $0x1d0] sm:$0xff] }
 0x1ed   :  { %v3637_v37 = vpop.f32.mrf.mxu0 }
 0x1ef   :  { %v612_v38 = vpop.f32.mrf.mxu0 }
 0x1f0   :  { %3673 = vmatprep.mubr.f32.mxu1 %v612_v38  ;;  %v1151_v38 = vld [vmem:[#allocation7 + $0xc8] sm:$0xff] }
 0x1f1   :  { %v3640_v39 = vpop.f32.mrf.mxu0  ;;  %3674 = vmatmul.mubr.f32.vlgmr.msra.gmra.mxu1 %v3637_v37  ;;  %v1152_v37 = vld [vmem:[#allocation7 + $0xd0] sm:$0xff] }
 0x1f3   :  { %v622_v40 = vpop.f32.mrf.mxu0 }
 0x1f4   :  { %3676 = vmatprep.mubr.f32.mxu1 %v622_v40  ;;  %v1149_v40 = vld [vmem:[#allocation7 + $0xb8] sm:$0xff] }
 0x1f5   :  { %3677 = vmatmul.mubr.f32.gmra.mxu1 %v3640_v39  ;;  %v1150_v39 = vld [vmem:[#allocation7 + $0xc0] sm:$0xff] }
 0x1f6   :  { %3747 = vmatprep.mubr.msk.f32.mxu1 %vm959_vm1, %v957_v60  ;;  %v1583_v60 = vld [vmem:[#allocation7 + $0x1e0] sm:$0xff] }
 0x1fd   :  { %v3697_v41 = vpop.f32.mrf.mxu0 }
 0x1ff   :  { %v820_v42 = vpop.f32.mrf.mxu0 }
 0x200   :  { %3733 = vmatprep.mubr.f32.mxu0 %v820_v42  ;;  %v1147_v42 = vld [vmem:[#allocation7 + $0xa8] sm:$0xff] }
 0x201   :  { %v3700_v44 = vpop.f32.mrf.mxu0  ;;  %3734 = vmatmul.mubr.f32.vlgmr.msra.gmra.mxu0 %v3697_v41  ;;  %v1148_v41 = vld [vmem:[#allocation7 + $0xb0] sm:$0xff] }
 0x202   :  { %3797 = vmatpush3.msra.mxu0 %v1056_v32  ;;  %v1157_v32 = vld [vmem:[#allocation7 + $0xf8] sm:$0xff] }
 0x203   :  { %v830_v46 = vpop.f32.mrf.mxu0  ;;  %3798 = vmatprep.subr.mxu0 %v1055_v43 }
 0x204   :  { %3736 = vmatprep.mubr.f32.mxu0 %v830_v46  ;;  %3799 = vmatpush3.msra.mxu0 %v1055_v43  ;;  %v1146_v43 = vld [vmem:[#allocation7 + $0xa0] sm:$0xff]  ;;  %v1143_v46 = vld [vmem:[#allocation7 + $0x88] sm:$0xff] }
 0x205   :  { %3737 = vmatmul.mubr.f32.gmra.mxu0 %v3700_v44  ;;  %3800 = vmatprep.subr.mxu0 %v1054_v45  ;;  %v1145_v44 = vld [vmem:[#allocation7 + $0x98] sm:$0xff] }
 0x206   :  { %3801 = vmatpush3.msra.mxu0 %v1054_v45  ;;  %v1144_v45 = vld [vmem:[#allocation7 + $0x90] sm:$0xff] }
 0x207   :  { %3802 = vmatprep.subr.mxu0 %v1053_v47 }
 0x208   :  { %3803 = vmatpush3.msra.mxu0 %v1053_v47  ;;  %v1142_v47 = vld [vmem:[#allocation7 + $0x80] sm:$0xff] }
 0x209   :  { %3804 = vmatprep.subr.mxu0 %v1052_v48 }
 0x20a   :  { %3805 = vmatpush3.msra.mxu0 %v1052_v48 }
 0x20b   :  { %3806 = vmatprep.subr.mxu0 %v1051_v49 }
 0x20c   :  { %3807 = vmatpush3.msra.mxu0 %v1051_v49 }
 0x20d   :  { %3808 = vmatprep.subr.mxu0 %v1050_v50 }
 0x20e   :  { %3809 = vmatpush3.msra.mxu0 %v1050_v50  ;;  %v1487_v50 = vld [vmem:[#allocation6 + $0x30] sm:$0xff] }
 0x20f   :  { %3810 = vmatprep.subr.mxu0 %v1049_v51 }
 0x210   :  { %3811 = vmatpush3.msra.mxu0 %v1049_v51 }
 0x211   :  { %3812 = vmatprep.subr.mxu0 %v1048_v52 }
 0x212   :  { %3813 = vmatpush3.msra.mxu0 %v1048_v52  ;;  %v1488_v52 = vld [vmem:[#allocation6 + $0x38] sm:$0xff] }
 0x213   :  { %3814 = vmatprep.subr.mxu0 %v1047_v53 }
 0x214   :  { %3815 = vmatpush3.msra.mxu0 %v1047_v53 }
 0x215   :  { %3816 = vmatprep.subr.mxu0 %v1046_v54 }
 0x216   :  { %3817 = vmatpush3.msra.mxu0 %v1046_v54  ;;  %v1309_v54 = vld [vmem:[#allocation6 + $0x20] sm:$0xff] }
 0x217   :  { %3818 = vmatprep.subr.mxu0 %v1045_v55 }
 0x218   :  { %3819 = vmatpush3.msra.mxu0 %v1045_v55  ;;  %v1586_v55 = vld [vmem:[#allocation7 + $0x1f8] sm:$0xff] }
 0x219   :  { %3820 = vmatprep.subr.mxu0 %v1044_v56 }
 0x21a   :  { %3821 = vmatpush3.msra.mxu0 %v1044_v56  ;;  %v1585_v56 = vld [vmem:[#allocation7 + $0x1f0] sm:$0xff] }
 0x21b   :  { %3822 = vmatprep.subr.mxu0 %v1043_v57 }
 0x21c   :  { %3823 = vmatpush3.msra.mxu0 %v1043_v57  ;;  %v1584_v57 = vld [vmem:[#allocation7 + $0x1e8] sm:$0xff] }
 0x21d   :  { %3824 = vmatprep.subr.mxu0 %v1042_v58 }
 0x21e   :  { %3825 = vmatpush3.msra.mxu0 %v1042_v58  ;;  %v1310_v58 = vld [vmem:[#allocation6 + $0x28] sm:$0xff] }
 0x21f   :  { %3826 = vmatprep.subr.mxu0 %v1041_v59 }
 0x220   :  { %3827 = vmatpush3.msra.mxu0 %v1041_v59  ;;  %v1408_v59 = vld [vmem:[#allocation7 + $0x178] sm:$0xff] }
 0x2b1   :  { %v3675_v9 = vpop.f32.mrf.mxu1 }
 0x2b2   :  { %v734_v7 = vadd.f32 %v3675_v9, %v516_v1  ;;  %v1405_v9 = vld [vmem:[#allocation7 + $0x160] sm:$0xff]  ;;  %v1403_v1 = vld [vmem:[#allocation7 + $0x150] sm:$0xff] }
 0x2b3   :  { %v714_v10 = vpop.f32.mrf.mxu1 }
 0x2b4   :  { %v733_v14 = vadd.f32 %v714_v10, %v511_v5  ;;  %v1580_v10 = vld [vmem:[#allocation7 + $0x1c8] sm:$0xff]  ;;  %v1577_v5 = vld [vmem:[#allocation7 + $0x1b0] sm:$0xff] }
 0x2b5   :  { %v3678_v11 = vpop.f32.mrf.mxu1 }
 0x2b6   :  { %v736_v12 = vadd.f32 %v3678_v11, %v526_v2  ;;  %v1404_v11 = vld [vmem:[#allocation7 + $0x158] sm:$0xff]  ;;  %v1402_v2 = vld [vmem:[#allocation7 + $0x148] sm:$0xff] }
 0x2b7   :  { %v724_v3 = vpop.f32.mrf.mxu1 }
 0x2b8   :  { %v735_v15 = vadd.f32 %v724_v3, %v521_v6  ;;  %v1578_v3 = vld [vmem:[#allocation7 + $0x1b8] sm:$0xff] }
 0x2b9   :  { %v1400_v6 = vld [vmem:[#allocation7 + $0x138] sm:$0xff] }
 0x2c1   :  { %v3735_v0 = vpop.f32.mrf.mxu0 }
 0x2c2   :  { %v942_v16 = vadd.f32 %v3735_v0, %v734_v7  ;;  %v1579_v0 = vld [vmem:[#allocation7 + $0x1c0] sm:$0xff]  ;;  %v1576_v7 = vld [vmem:[#allocation7 + $0x1a8] sm:$0xff] }
 0x2c3   :  { %v922_v4 = vpop.f32.mrf.mxu0 }
 0x2c4   :  { %v941_v19 = vadd.f32 %v922_v4, %v733_v14  ;;  %v950_v22 = vmul.f32 0.2, %v942_v16  ;;  %vm946_vm4 = vcmp.ge.f32.partialorder %v942_v16, 0.0  ;;  %v1401_v4 = vld [vmem:[#allocation7 + $0x140] sm:$0xff]  ;;  %v1398_v14 = vld [vmem:[#allocation7 + $0x128] sm:$0xff] }
 0x2c5   :  { %v3738_v13 = vpop.f32.mrf.mxu0 }
 0x2c6   :  { %v944_v17 = vadd.f32 %v3738_v13, %v736_v12  ;;  %v949_v25 = vmul.f32 0.2, %v941_v19  ;;  %vm945_vm5 = vcmp.ge.f32.partialorder %v941_v19, 0.0  ;;  %v4798_v27 = vsel %vm946_vm4, %v942_v16, %v950_v22  ;;  %v1399_v12 = vld [vmem:[#allocation7 + $0x130] sm:$0xff]  ;;  %v1575_v13 = vld [vmem:[#allocation7 + $0x1a0] sm:$0xff]  ;;  %v1394_v22 = vld [vmem:[#allocation7 + $0x108] sm:$0xff] }
 0x2c7   :  { %v932_v18 = vpop.f32.mrf.mxu0  ;;  %v1397_v16 = vld [vmem:[#allocation7 + $0x120] sm:$0xff] }
 0x2c8   :  { %vm948_vm2 = vcmp.ge.f32.partialorder %v944_v17, 0.0  ;;  %v952_v20 = vmul.f32 0.2, %v944_v17  ;;  %v943_v21 = vadd.f32 %v932_v18, %v735_v15  ;;  %v4802_v28 = vsel %vm945_vm5, %v941_v19, %v949_v25  ;;  %v1574_v15 = vld [vmem:[#allocation7 + $0x198] sm:$0xff]  ;;  %v1572_v19 = vld [vmem:[#allocation7 + $0x188] sm:$0xff] }
 0x2c9   :  { %v1396_v18 = vld [vmem:[#allocation7 + $0x118] sm:$0xff] }
 0x2ca   :  { %v4790_v23 = vsel %vm948_vm2, %v944_v17, %v952_v20  ;;  %vm947_vm3 = vcmp.ge.f32.partialorder %v943_v21, 0.0  ;;  %v951_v24 = vmul.f32 0.2, %v943_v21  ;;  %v1573_v17 = vld [vmem:[#allocation7 + $0x190] sm:$0xff] }
 0x2cb   :  { %3739 = vmatprep.subr.mxu1 %v4790_v23  ;;  %3877 = vmatprep.subr.mxu0 %v4790_v23  ;;  %v1395_v20 = vld [vmem:[#allocation7 + $0x110] sm:$0xff] }
 0x2cc   :  { %v4794_v26 = vsel %vm947_vm3, %v943_v21, %v951_v24  ;;  %3740 = vmatpush3.msra.mxu1 %v4790_v23  ;;  %v1571_v21 = vld [vmem:[#allocation7 + $0x180] sm:$0xff] }
 0x2cd   :  { %3741 = vmatprep.subr.mxu1 %v4794_v26 }
 0x2ce   :  { %3742 = vmatpush3.msra.mxu1 %v4794_v26 }
 0x2cf   :  { %3743 = vmatprep.subr.mxu1 %v4798_v27 }
 0x2d0   :  { %3744 = vmatpush3.msra.mxu1 %v4798_v27 }
 0x2d1   :  { %3745 = vmatprep.subr.mxu1 %v4802_v28 }
 0x2d2   :  { %3746 = vmatpush3.msra.mxu1 %v4802_v28 }
 0x2d3   :  { %3748 = vmatmul.mubr.msk.f32.vlgmr.msra.gmra.mxu1 %vm959_vm1, %v958_v29  ;;  %3750 = vmatprep.subr.mxu1 %v4790_v23 }
 0x2d4   :  { %3751 = vmatpush3.msra.mxu1 %v4790_v23  ;;  %3758 = vmatprep.mubr.msk.f32.mxu1 %vm959_vm1, %v1058_v30 }
 0x2d5   :  { %3752 = vmatprep.subr.mxu1 %v4794_v26 }
 0x2d6   :  { %3753 = vmatpush3.msra.mxu1 %v4794_v26 }
 0x2d7   :  { %3754 = vmatprep.subr.mxu1 %v4798_v27 }
 0x2d8   :  { %3755 = vmatpush3.msra.mxu1 %v4798_v27 }
 0x2d9   :  { %3756 = vmatprep.subr.mxu1 %v4802_v28 }
 0x2da   :  { %3757 = vmatpush3.msra.mxu1 %v4802_v28 }
 0x2db   :  { %3759 = vmatmul.mubr.msk.f32.vlgmr.msra.gmra.mxu1 %vm959_vm1, %v1059_v31  ;;  %3761 = vmatprep.subr.mxu1 %v1157_v32 }
 0x2dc   :  { %3762 = vmatpush3.msra.mxu1 %v1157_v32 }
 0x2dd   :  { %3763 = vmatprep.subr.mxu1 %v1156_v33 }
 0x2de   :  { %3764 = vmatpush3.msra.mxu1 %v1156_v33 }
 0x2df   :  { %3765 = vmatprep.subr.mxu1 %v1155_v34 }
 0x2e0   :  { %3766 = vmatpush3.msra.mxu1 %v1155_v34  ;;  %v4401_v34 = vmov 0.0  }
 0x2e1   :  { %3767 = vmatprep.subr.mxu1 %v1154_v35 }
 0x2e2   :  { %3768 = vmatpush3.msra.mxu1 %v1154_v35  ;;  %v1760_v35 = vld [vmem:[#allocation10 + $0x78] sm:$0xff] }
 0x2e3   :  { %3769 = vmatprep.subr.mxu1 %v1153_v36 }
 0x2e4   :  { %3770 = vmatpush3.msra.mxu1 %v1153_v36  ;;  %v1759_v36 = vld [vmem:[#allocation10 + $0x70] sm:$0xff] }
 0x2e5   :  { %3771 = vmatprep.subr.mxu1 %v1152_v37 }
 0x2e6   :  { %3772 = vmatpush3.msra.mxu1 %v1152_v37  ;;  %v1758_v37 = vld [vmem:[#allocation10 + $0x68] sm:$0xff] }
 0x2e7   :  { %3773 = vmatprep.subr.mxu1 %v1151_v38 }
 0x2e8   :  { %3774 = vmatpush3.msra.mxu1 %v1151_v38  ;;  %v1757_v38 = vld [vmem:[#allocation10 + $0x60] sm:$0xff] }
 0x2e9   :  { %3775 = vmatprep.subr.mxu1 %v1150_v39 }
 0x2ea   :  { %3776 = vmatpush3.msra.mxu1 %v1150_v39  ;;  %v1756_v39 = vld [vmem:[#allocation10 + $0x58] sm:$0xff] }
 0x2eb   :  { %3777 = vmatprep.subr.mxu1 %v1149_v40 }
 0x2ec   :  { %3778 = vmatpush3.msra.mxu1 %v1149_v40  ;;  %v1755_v40 = vld [vmem:[#allocation10 + $0x50] sm:$0xff] }
 0x2ed   :  { %3779 = vmatprep.subr.mxu1 %v1148_v41 }
 0x2ee   :  { %3780 = vmatpush3.msra.mxu1 %v1148_v41  ;;  %v1754_v41 = vld [vmem:[#allocation10 + $0x48] sm:$0xff] }
 0x2ef   :  { %3781 = vmatprep.subr.mxu1 %v1147_v42 }
 0x2f0   :  { %3782 = vmatpush3.msra.mxu1 %v1147_v42  ;;  %v1753_v42 = vld [vmem:[#allocation10 + $0x40] sm:$0xff] }
 0x2f1   :  { %3783 = vmatprep.subr.mxu1 %v1146_v43 }
 0x2f2   :  { %3784 = vmatpush3.msra.mxu1 %v1146_v43  ;;  %v1752_v43 = vld [vmem:[#allocation10 + $0x38] sm:$0xff] }
 0x2f3   :  { %3785 = vmatprep.subr.mxu1 %v1145_v44 }
 0x2f4   :  { %3786 = vmatpush3.msra.mxu1 %v1145_v44  ;;  %v1751_v44 = vld [vmem:[#allocation10 + $0x30] sm:$0xff] }
 0x2f5   :  { %3787 = vmatprep.subr.mxu1 %v1144_v45 }
 0x2f6   :  { %3788 = vmatpush3.msra.mxu1 %v1144_v45  ;;  %v1750_v45 = vld [vmem:[#allocation10 + $0x28] sm:$0xff] }
 0x2f7   :  { %3789 = vmatprep.subr.mxu1 %v1143_v46 }
 0x2f8   :  { %3790 = vmatpush3.msra.mxu1 %v1143_v46  ;;  %v1749_v46 = vld [vmem:[#allocation10 + $0x20] sm:$0xff] }
 0x2f9   :  { %3791 = vmatprep.subr.mxu1 %v1142_v47 }
 0x2fa   :  { %3792 = vmatpush3.msra.mxu1 %v1142_v47  ;;  %v1748_v47 = vld [vmem:[#allocation10 + $0x18] sm:$0xff] }
 0x2fb   :  { %3831 = vmatprep.subr.mxu1 %v4790_v23 }
 0x393   :  { %v3749_v48 = vpop.f32.mrf.mxu1 }
 0x395   :  { %v1032_v49 = vpop.f32.mrf.mxu1 }
 0x396   :  { %3828 = vmatprep.mubr.f32.mxu0 %v1032_v49  ;;  %v1746_v49 = vld [vmem:[#allocation10 + $0x8] sm:$0xff] }
 0x397   :  { %3829 = vmatmul.mubr.f32.vlgmr.msra.gmra.mxu0 %v3749_v48  ;;  %v1747_v48 = vld [vmem:[#allocation10 + $0x10] sm:$0xff] }
 0x398   :  { %3878 = vmatpush3.msra.mxu0 %v4790_v23  ;;  %3885 = vmatprep.mubr.msk.f32.mxu0 %vm959_vm1, %v1487_v50 }
 0x399   :  { %3879 = vmatprep.subr.mxu0 %v4794_v26 }
 0x39a   :  { %3880 = vmatpush3.msra.mxu0 %v4794_v26 }
 0x39b   :  { %3881 = vmatprep.subr.mxu0 %v4798_v27  ;;  %v3760_v51 = vpop.f32.mrf.mxu1 }
 0x39c   :  { %3882 = vmatpush3.msra.mxu0 %v4798_v27 }
 0x39d   :  { %3883 = vmatprep.subr.mxu0 %v4802_v28  ;;  %v1132_v53 = vpop.f32.mrf.mxu1 }
 0x39e   :  { %3884 = vmatpush3.msra.mxu0 %v4802_v28  ;;  %3793 = vmatprep.mubr.f32.mxu1 %v1132_v53 }
 0x39f   :  { %3794 = vmatmul.mubr.f32.vlgmr.msra.gmra.mxu1 %v3760_v51  ;;  %3886 = vmatmul.mubr.msk.f32.vlgmr.msra.gmra.mxu0 %vm959_vm1, %v1488_v52 }
 0x3a0   :  { %3832 = vmatpush3.msra.mxu1 %v4790_v23  ;;  %3839 = vmatprep.mubr.msk.f32.mxu1 %vm959_vm1, %v1309_v54  ;;  %v1393_v23 = vld [vmem:[#allocation7 + $0x100] sm:$0xff] }
 0x3a1   :  { %3833 = vmatprep.subr.mxu1 %v4794_v26  ;;  %3888 = vmatprep.subr.mxu0 %v1586_v55 }
 0x3a2   :  { %3834 = vmatpush3.msra.mxu1 %v4794_v26  ;;  %3889 = vmatpush3.msra.mxu0 %v1586_v55 }
 0x3a3   :  { %3835 = vmatprep.subr.mxu1 %v4798_v27  ;;  %3890 = vmatprep.subr.mxu0 %v1585_v56 }
 0x3a4   :  { %3836 = vmatpush3.msra.mxu1 %v4798_v27  ;;  %3891 = vmatpush3.msra.mxu0 %v1585_v56 }
 0x3a5   :  { %3837 = vmatprep.subr.mxu1 %v4802_v28  ;;  %3892 = vmatprep.subr.mxu0 %v1584_v57 }
 0x3a6   :  { %3838 = vmatpush3.msra.mxu1 %v4802_v28  ;;  %3893 = vmatpush3.msra.mxu0 %v1584_v57 }
 0x3a7   :  { %3840 = vmatmul.mubr.msk.f32.vlgmr.msra.gmra.mxu1 %vm959_vm1, %v1310_v58  ;;  %3842 = vmatprep.subr.mxu1 %v1408_v59 }
 0x3a8   :  { %3843 = vmatpush3.msra.mxu1 %v1408_v59  ;;  %3894 = vmatprep.subr.mxu0 %v1583_v60 }
 0x3a9   :  { %3844 = vmatprep.subr.mxu1 %v1407_v61  ;;  %3895 = vmatpush3.msra.mxu0 %v1583_v60 }
 0x3aa   :  { %3845 = vmatpush3.msra.mxu1 %v1407_v61  ;;  %3896 = vmatprep.subr.mxu0 %v1582_v62  ;;  %v1670_v61 = vld [vmem:[#allocation9] sm:$0xff] }
 0x3ab   :  { %3846 = vmatprep.subr.mxu1 %v1406_v63  ;;  %3897 = vmatpush3.msra.mxu0 %v1582_v62 }
 0x3ac   :  { %3847 = vmatpush3.msra.mxu1 %v1406_v63  ;;  %3898 = vmatprep.subr.mxu0 %v1581_v8  ;;  %v1762_v63 = vld [vmem:[#allocation9 + $0x8] sm:$0xff] }
 0x3ad   :  { %3848 = vmatprep.subr.mxu1 %v1405_v9  ;;  %3899 = vmatpush3.msra.mxu0 %v1581_v8  ;;  %v1852_v8 = vld [vmem:[#allocation10 + $0xf8] sm:$0xff] }
 0x3ae   :  { %3849 = vmatpush3.msra.mxu1 %v1405_v9  ;;  %3900 = vmatprep.subr.mxu0 %v1580_v10  ;;  %v1851_v9 = vld [vmem:[#allocation10 + $0xf0] sm:$0xff] }
 0x3af   :  { %3850 = vmatprep.subr.mxu1 %v1404_v11  ;;  %3901 = vmatpush3.msra.mxu0 %v1580_v10  ;;  %v1850_v10 = vld [vmem:[#allocation10 + $0xe8] sm:$0xff] }
 0x3b0   :  { %3851 = vmatpush3.msra.mxu1 %v1404_v11  ;;  %3902 = vmatprep.subr.mxu0 %v1579_v0  ;;  %v1849_v11 = vld [vmem:[#allocation10 + $0xe0] sm:$0xff] }
 0x3b1   :  { %3852 = vmatprep.subr.mxu1 %v1403_v1  ;;  %3903 = vmatpush3.msra.mxu0 %v1579_v0  ;;  %v1848_v0 = vld [vmem:[#allocation10 + $0xd8] sm:$0xff] }
 0x3b2   :  { %3853 = vmatpush3.msra.mxu1 %v1403_v1  ;;  %3904 = vmatprep.subr.mxu0 %v1578_v3  ;;  %v1847_v1 = vld [vmem:[#allocation10 + $0xd0] sm:$0xff] }
 0x3b3   :  { %3854 = vmatprep.subr.mxu1 %v1402_v2  ;;  %3905 = vmatpush3.msra.mxu0 %v1578_v3  ;;  %v1845_v3 = vld [vmem:[#allocation10 + $0xc0] sm:$0xff] }
 0x3b4   :  { %3855 = vmatpush3.msra.mxu1 %v1402_v2  ;;  %3906 = vmatprep.subr.mxu0 %v1577_v5  ;;  %v1846_v2 = vld [vmem:[#allocation10 + $0xc8] sm:$0xff] }
 0x3b5   :  { %3856 = vmatprep.subr.mxu1 %v1401_v4  ;;  %3907 = vmatpush3.msra.mxu0 %v1577_v5  ;;  %v1843_v5 = vld [vmem:[#allocation10 + $0xb0] sm:$0xff] }
 0x3b6   :  { %3857 = vmatpush3.msra.mxu1 %v1401_v4  ;;  %3908 = vmatprep.subr.mxu0 %v1576_v7  ;;  %v1844_v4 = vld [vmem:[#allocation10 + $0xb8] sm:$0xff] }
 0x3b7   :  { %3858 = vmatprep.subr.mxu1 %v1400_v6  ;;  %3909 = vmatpush3.msra.mxu0 %v1576_v7  ;;  %v1841_v7 = vld [vmem:[#allocation10 + $0xa0] sm:$0xff] }
 0x3b8   :  { %3859 = vmatpush3.msra.mxu1 %v1400_v6  ;;  %3910 = vmatprep.subr.mxu0 %v1575_v13  ;;  %v1842_v6 = vld [vmem:[#allocation10 + $0xa8] sm:$0xff] }
 0x3b9   :  { %3860 = vmatprep.subr.mxu1 %v1399_v12  ;;  %3911 = vmatpush3.msra.mxu0 %v1575_v13  ;;  %v1839_v13 = vld [vmem:[#allocation10 + $0x90] sm:$0xff] }
 0x3ba   :  { %3861 = vmatpush3.msra.mxu1 %v1399_v12  ;;  %3912 = vmatprep.subr.mxu0 %v1574_v15  ;;  %v1840_v12 = vld [vmem:[#allocation10 + $0x98] sm:$0xff] }
 0x3bb   :  { %3862 = vmatprep.subr.mxu1 %v1398_v14  ;;  %3913 = vmatpush3.msra.mxu0 %v1574_v15  ;;  %v1838_v15 = vld [vmem:[#allocation10 + $0x88] sm:$0xff] }
 0x3bc   :  { %3863 = vmatpush3.msra.mxu1 %v1398_v14  ;;  %3914 = vmatprep.subr.mxu0 %v1573_v17  ;;  %v1745_v14 = vld [vmem:[#allocation10] sm:$0xff] }
 0x3bd   :  { %3864 = vmatprep.subr.mxu1 %v1397_v16  ;;  %3915 = vmatpush3.msra.mxu0 %v1573_v17 }
 0x3be   :  { %3865 = vmatpush3.msra.mxu1 %v1397_v16  ;;  %3916 = vmatprep.subr.mxu0 %v1572_v19  ;;  %v1837_v16 = vld [vmem:[#allocation10 + $0x80] sm:$0xff] }
 0x3bf   :  { %3866 = vmatprep.subr.mxu1 %v1396_v18  ;;  %3917 = vmatpush3.msra.mxu0 %v1572_v19 }
 0x3c0   :  { %3867 = vmatpush3.msra.mxu1 %v1396_v18  ;;  %3918 = vmatprep.subr.mxu0 %v1571_v21 }
 0x3c1   :  { %3868 = vmatprep.subr.mxu1 %v1395_v20  ;;  %3919 = vmatpush3.msra.mxu0 %v1571_v21  ;;  %v1994_v21 = vld [vmem:[#allocation9 + $0x10] sm:$0xff] }
 0x3c2   :  { %3869 = vmatpush3.msra.mxu1 %v1395_v20  ;;  %3972 = vmatprep.subr.mxu0 %v4401_v34 }
 0x3c3   :  { %3870 = vmatprep.subr.mxu1 %v1394_v22 }
 0x3c4   :  { %3871 = vmatpush3.msra.mxu1 %v1394_v22  ;;  %v2084_v22 = vld [vmem:[#allocation10 + $0x178] sm:$0xff] }
 0x3c5   :  { %3872 = vmatprep.subr.mxu1 %v1393_v23 }
 0x3c6   :  { %3873 = vmatpush3.msra.mxu1 %v1393_v23  ;;  %v2083_v23 = vld [vmem:[#allocation10 + $0x170] sm:$0xff] }
 0x3c7   :  { %3923 = vmatprep.subr.mxu1 %v4401_v34 }
 0x457   :  { %v3830_v24 = vpop.f32.mrf.mxu0 }
 0x459   :  { %v1299_v25 = vpop.f32.mrf.mxu0 }
 0x45f   :  { %v3795_v26 = vpop.f32.mrf.mxu1  ;;  %v3887_v27 = vpop.f32.mrf.mxu0 }
 0x460   :  { %v4837_v28 = vadd.f32 %v3830_v24, %v3795_v26  ;;  %v2082_v24 = vld [vmem:[#allocation10 + $0x168] sm:$0xff]  ;;  %v2080_v26 = vld [vmem:[#allocation10 + $0x158] sm:$0xff] }
 0x461   :  { %v1224_v29 = vpop.f32.mrf.mxu1  ;;  %v1561_v30 = vpop.f32.mrf.mxu0 }
 0x462   :  { %v4839_v31 = vadd.f32 %v1299_v25, %v1224_v29  ;;  %3920 = vmatprep.mubr.f32.mxu0 %v1561_v30  ;;  %v2081_v25 = vld [vmem:[#allocation10 + $0x160] sm:$0xff]  ;;  %v2076_v30 = vld [vmem:[#allocation10 + $0x138] sm:$0xff] }
 0x463   :  { %3921 = vmatmul.mubr.f32.vlgmr.msra.gmra.mxu0 %v3887_v27  ;;  %v2079_v27 = vld [vmem:[#allocation10 + $0x150] sm:$0xff]  ;;  %v2077_v29 = vld [vmem:[#allocation10 + $0x140] sm:$0xff] }
 0x464   :  { %4004 = vmatprep.mubr.msk.f32.mxu0 %vm4402_vm6, %v4401_v34  ;;  %3973 = vmatpush3.msra.mxu0 %v1760_v35  ;;  %v2072_v35 = vld [vmem:[#allocation10 + $0x118] sm:$0xff] }
 0x465   :  { %3974 = vmatprep.subr.mxu0 %v4401_v34 }
 0x466   :  { %3975 = vmatpush3.msra.mxu0 %v1759_v36  ;;  %v2071_v36 = vld [vmem:[#allocation10 + $0x110] sm:$0xff] }
 0x467   :  { %v3841_v32 = vpop.f32.mrf.mxu1  ;;  %3976 = vmatprep.subr.mxu0 %v4401_v34 }
 0x468   :  { %3977 = vmatpush3.msra.mxu0 %v1758_v37  ;;  %v2070_v37 = vld [vmem:[#allocation10 + $0x108] sm:$0xff] }
 0x469   :  { %v1383_v33 = vpop.f32.mrf.mxu1  ;;  %3978 = vmatprep.subr.mxu0 %v4401_v34 }
 0x46a   :  { %3874 = vmatprep.mubr.f32.mxu1 %v1383_v33  ;;  %3979 = vmatpush3.msra.mxu0 %v1757_v38  ;;  %v2073_v33 = vld [vmem:[#allocation10 + $0x120] sm:$0xff] }
 0x46b   :  { %3875 = vmatmul.mubr.f32.vlgmr.msra.gmra.mxu1 %v3841_v32  ;;  %3980 = vmatprep.subr.mxu0 %v4401_v34  ;;  %v2074_v32 = vld [vmem:[#allocation10 + $0x128] sm:$0xff]  ;;  %v2069_v38 = vld [vmem:[#allocation10 + $0x100] sm:$0xff] }
 0x46c   :  { %3927 = vmatprep.mubr.msk.f32.mxu1 %vm4402_vm6, %v4401_v34  ;;  %3981 = vmatpush3.msra.mxu0 %v1756_v39  ;;  %v2247_v39 = vld [vmem:[#allocation10 + $0x1f8] sm:$0xff] }
 0x46d   :  { %3982 = vmatprep.subr.mxu0 %v4401_v34 }
 0x46e   :  { %3983 = vmatpush3.msra.mxu0 %v1755_v40  ;;  %v2246_v40 = vld [vmem:[#allocation10 + $0x1f0] sm:$0xff] }
 0x46f   :  { %3984 = vmatprep.subr.mxu0 %v4401_v34 }
 0x470   :  { %3985 = vmatpush3.msra.mxu0 %v1754_v41  ;;  %v2245_v41 = vld [vmem:[#allocation10 + $0x1e8] sm:$0xff] }
 0x471   :  { %3986 = vmatprep.subr.mxu0 %v4401_v34 }
 0x472   :  { %3987 = vmatpush3.msra.mxu0 %v1753_v42  ;;  %v2244_v42 = vld [vmem:[#allocation10 + $0x1e0] sm:$0xff] }
 0x473   :  { %3988 = vmatprep.subr.mxu0 %v4401_v34 }
 0x474   :  { %3989 = vmatpush3.msra.mxu0 %v1752_v43  ;;  %v2243_v43 = vld [vmem:[#allocation10 + $0x1d8] sm:$0xff] }
 0x475   :  { %3990 = vmatprep.subr.mxu0 %v4401_v34 }
 0x476   :  { %3991 = vmatpush3.msra.mxu0 %v1751_v44  ;;  %v2242_v44 = vld [vmem:[#allocation10 + $0x1d0] sm:$0xff] }
 0x477   :  { %3992 = vmatprep.subr.mxu0 %v4401_v34 }
 0x478   :  { %3993 = vmatpush3.msra.mxu0 %v1750_v45  ;;  %v2241_v45 = vld [vmem:[#allocation10 + $0x1c8] sm:$0xff] }
 0x479   :  { %3994 = vmatprep.subr.mxu0 %v4401_v34 }
 0x47a   :  { %3995 = vmatpush3.msra.mxu0 %v1749_v46  ;;  %v2240_v46 = vld [vmem:[#allocation10 + $0x1c0] sm:$0xff] }
 0x47b   :  { %3996 = vmatprep.subr.mxu0 %v4401_v34 }
 0x47c   :  { %3997 = vmatpush3.msra.mxu0 %v1748_v47  ;;  %v2239_v47 = vld [vmem:[#allocation10 + $0x1b8] sm:$0xff] }
 0x47d   :  { %3998 = vmatprep.subr.mxu0 %v4401_v34 }
 0x47e   :  { %3999 = vmatpush3.msra.mxu0 %v1747_v48  ;;  %v2238_v48 = vld [vmem:[#allocation10 + $0x1b0] sm:$0xff] }
 0x47f   :  { %4000 = vmatprep.subr.mxu0 %v4401_v34 }
 0x480   :  { %4001 = vmatpush3.msra.mxu0 %v1746_v49  ;;  %v2237_v49 = vld [vmem:[#allocation10 + $0x1a8] sm:$0xff] }
 0x481   :  { %4002 = vmatprep.subr.mxu0 %v4401_v34 }
 0x482   :  { %4003 = vmatpush3.msra.mxu0 %v1745_v14  ;;  %v3071_v14 = vld [vmem:[%s5256_s8 + $0xa8] sm:$0xff] }
 0x483   :  { %4056 = vmatprep.subr.mxu0 %v4401_v34 }
 0x523   :  { %v3922_v50 = vpop.f32.mrf.mxu0 }
 0x525   :  { %v1653_v56 = vpop.f32.mrf.mxu0 }
 0x52b   :  { %v3876_v51 = vpop.f32.mrf.mxu1 }
 0x52c   :  { %v1485_v52 = vadd.f32 %v3876_v51, %v4837_v28  ;;  %v2078_v28 = vld [vmem:[#allocation10 + $0x148] sm:$0xff]  ;;  %v2235_v51 = vld [vmem:[#allocation10 + $0x198] sm:$0xff] }
 0x52d   :  { %v1475_v53 = vpop.f32.mrf.mxu1 }
 0x52e   :  { %v1663_v54 = vadd.f32 %v3922_v50, %v1485_v52  ;;  %v1484_v55 = vadd.f32 %v1475_v53, %v4839_v31  ;;  %v2075_v31 = vld [vmem:[#allocation10 + $0x130] sm:$0xff]  ;;  %v2236_v50 = vld [vmem:[#allocation10 + $0x1a0] sm:$0xff] }
 0x530   :  { %v1667_v57 = vmul.f32 0.2, %v1663_v54  ;;  %v1662_v58 = vadd.f32 %v1653_v56, %v1484_v55  ;;  %vm1665_vm7 = vcmp.ge.f32.partialorder %v1663_v54, 0.0 }
 0x532   :  { %v1666_v59 = vmul.f32 0.2, %v1662_v58  ;;  %v4864_v60 = vsel %vm1665_vm7, %v1663_v54, %v1667_v57  ;;  %vm1664_vm8 = vcmp.ge.f32.partialorder %v1662_v58, 0.0 }
 0x533   :  { %3924 = vmatpush3.msra.mxu1 %v4864_v60 }
 0x534   :  { %3925 = vmatprep.subr.mxu1 %v4401_v34  ;;  %v4868_v62 = vsel %vm1664_vm8, %v1662_v58, %v1666_v59  ;;  %v2157_v59 = vld [vmem:[#allocation9 + $0x18] sm:$0xff] }
 0x535   :  { %3926 = vmatpush3.msra.mxu1 %v4868_v62 }
 0x536   :  { %3928 = vmatmul.mubr.msk.f32.vlgmr.msra.gmra.mxu1 %vm1671_vm9, %v1670_v61  ;;  %3930 = vmatprep.subr.mxu1 %v4401_v34  ;;  %v2234_v61 = vld [vmem:[#allocation10 + $0x190] sm:$0xff] }
 0x537   :  { %3931 = vmatpush3.msra.mxu1 %v4864_v60  ;;  %3934 = vmatprep.mubr.msk.f32.mxu1 %vm4402_vm6, %v4401_v34 }
 0x538   :  { %3932 = vmatprep.subr.mxu1 %v4401_v34 }
 0x539   :  { %3933 = vmatpush3.msra.mxu1 %v4868_v62 }
 0x53a   :  { %3935 = vmatmul.mubr.msk.f32.vlgmr.msra.gmra.mxu1 %vm1671_vm9, %v1762_v63  ;;  %3937 = vmatprep.subr.mxu1 %v4401_v34  ;;  %v2232_v63 = vld [vmem:[#allocation10 + $0x180] sm:$0xff] }
 0x53b   :  { %3938 = vmatpush3.msra.mxu1 %v1852_v8  ;;  %3969 = vmatprep.mubr.msk.f32.mxu1 %vm4402_vm6, %v4401_v34 }
 0x53c   :  { %3939 = vmatprep.subr.mxu1 %v4401_v34 }
 0x53d   :  { %3940 = vmatpush3.msra.mxu1 %v1851_v9 }
 0x53e   :  { %3941 = vmatprep.subr.mxu1 %v4401_v34 }
 0x53f   :  { %3942 = vmatpush3.msra.mxu1 %v1850_v10 }
 0x540   :  { %3943 = vmatprep.subr.mxu1 %v4401_v34 }
 0x541   :  { %3944 = vmatpush3.msra.mxu1 %v1849_v11 }
 0x542   :  { %3945 = vmatprep.subr.mxu1 %v4401_v34 }
 0x543   :  { %3946 = vmatpush3.msra.mxu1 %v1848_v0  ;;  %v3081_v0 = vld [vmem:[%s5256_s8 + $0xf8] sm:$0xff] }
 0x544   :  { %3947 = vmatprep.subr.mxu1 %v4401_v34 }
 0x545   :  { %3948 = vmatpush3.msra.mxu1 %v1847_v1  ;;  %v3080_v1 = vld [vmem:[%s5256_s8 + $0xf0] sm:$0xff] }
 0x546   :  { %3949 = vmatprep.subr.mxu1 %v4401_v34 }
 0x547   :  { %3950 = vmatpush3.msra.mxu1 %v1846_v2  ;;  %v3079_v2 = vld [vmem:[%s5256_s8 + $0xe8] sm:$0xff] }
 0x548   :  { %3951 = vmatprep.subr.mxu1 %v4401_v34 }
 0x549   :  { %3952 = vmatpush3.msra.mxu1 %v1845_v3  ;;  %v3078_v3 = vld [vmem:[%s5256_s8 + $0xe0] sm:$0xff] }
 0x54a   :  { %3953 = vmatprep.subr.mxu1 %v4401_v34 }
 0x54b   :  { %3954 = vmatpush3.msra.mxu1 %v1844_v4  ;;  %v3077_v4 = vld [vmem:[%s5256_s8 + $0xd8] sm:$0xff] }
 0x54c   :  { %3955 = vmatprep.subr.mxu1 %v4401_v34 }
 0x54d   :  { %3956 = vmatpush3.msra.mxu1 %v1843_v5  ;;  %v3076_v5 = vld [vmem:[%s5256_s8 + $0xd0] sm:$0xff] }
 0x54e   :  { %3957 = vmatprep.subr.mxu1 %v4401_v34 }
 0x54f   :  { %3958 = vmatpush3.msra.mxu1 %v1842_v6  ;;  %v3075_v6 = vld [vmem:[%s5256_s8 + $0xc8] sm:$0xff] }
 0x550   :  { %3959 = vmatprep.subr.mxu1 %v4401_v34 }
 0x551   :  { %3960 = vmatpush3.msra.mxu1 %v1841_v7  ;;  %v3074_v7 = vld [vmem:[%s5256_s8 + $0xc0] sm:$0xff] }
 0x552   :  { %3961 = vmatprep.subr.mxu1 %v4401_v34 }
 0x553   :  { %3962 = vmatpush3.msra.mxu1 %v1840_v12  ;;  %v3073_v12 = vld [vmem:[%s5256_s8 + $0xb8] sm:$0xff] }
 0x554   :  { %3963 = vmatprep.subr.mxu1 %v4401_v34 }
 0x555   :  { %3964 = vmatpush3.msra.mxu1 %v1839_v13  ;;  %v3072_v13 = vld [vmem:[%s5256_s8 + $0xb0] sm:$0xff] }
 0x556   :  { %3965 = vmatprep.subr.mxu1 %v4401_v34 }
 0x557   :  { %3966 = vmatpush3.msra.mxu1 %v1838_v15  ;;  %v3070_v15 = vld [vmem:[%s5256_s8 + $0xa0] sm:$0xff] }
 0x558   :  { %3967 = vmatprep.subr.mxu1 %v4401_v34 }
 0x559   :  { %3968 = vmatpush3.msra.mxu1 %v1837_v16  ;;  %v3069_v16 = vld [vmem:[%s5256_s8 + $0x98] sm:$0xff] }
 0x55a   :  { %4007 = vmatprep.subr.mxu1 %v4401_v34 }
 0x5f6   :  { %v1741_v17 = vpop.f32.mrf.mxu1 }
 0x5f7   :  { %4005 = vmatmul.mubr.f32.vlgmr.msra.gmra.mxu0 %v1741_v17  ;;  %v3068_v17 = vld [vmem:[%s5256_s8 + $0x90] sm:$0xff] }
 0x5f8   :  { %v3929_v18 = vpop.f32.mrf.mxu1  ;;  %4088 = vmatprep.mubr.msk.f32.mxu0 %vm4402_vm6, %v4401_v34  ;;  %4057 = vmatpush3.msra.mxu0 %v2247_v39  ;;  %v2399_v39 = vld [vmem:[%s5256_s8 + $0x10] sm:$0xff] }
 0x5f9   :  { %4058 = vmatprep.subr.mxu0 %v4401_v34 }
 0x5fa   :  { %v1832_v19 = vpop.f32.mrf.mxu1  ;;  %4059 = vmatpush3.msra.mxu0 %v2246_v40  ;;  %v2398_v40 = vld [vmem:[%s5256_s8 + $0x8] sm:$0xff] }
 0x5fb   :  { %3970 = vmatmul.mubr.f32.vlgmr.msra.gmra.mxu1 %v1832_v19  ;;  %4060 = vmatprep.subr.mxu0 %v4401_v34 }
 0x5fc   :  { %4008 = vmatpush3.msra.mxu1 %v4864_v60  ;;  %v3936_v20 = vpop.f32.mrf.mxu1  ;;  %4011 = vmatprep.mubr.msk.f32.mxu1 %vm4402_vm6, %v4401_v34 }
 0x5fd   :  { %4009 = vmatprep.subr.mxu1 %v4401_v34  ;;  %4061 = vmatpush3.msra.mxu0 %v2245_v41  ;;  %v3067_v41 = vld [vmem:[%s5256_s8 + $0x88] sm:$0xff] }
 0x5fe   :  { %4010 = vmatpush3.msra.mxu1 %v4868_v62  ;;  %4062 = vmatprep.subr.mxu0 %v4401_v34 }
 0x5ff   :  { %4012 = vmatmul.mubr.msk.f32.vlgmr.msra.gmra.mxu1 %vm1671_vm9, %v1994_v21  ;;  %4014 = vmatprep.subr.mxu1 %v4401_v34 }
 0x600   :  { %4015 = vmatpush3.msra.mxu1 %v2084_v22  ;;  %4046 = vmatprep.mubr.msk.f32.mxu1 %vm4402_vm6, %v4401_v34  ;;  %v2322_v22 = vld [vmem:[%s5255_s7] sm:$0x3] }
 0x601   :  { %4016 = vmatprep.subr.mxu1 %v4401_v34  ;;  %4063 = vmatpush3.msra.mxu0 %v2244_v42  ;;  %v2397_v42 = vld [vmem:[%s5256_s8] sm:$0xff] }
 0x602   :  { %4017 = vmatpush3.msra.mxu1 %v2083_v23  ;;  %4064 = vmatprep.subr.mxu0 %v4401_v34 }
 0x603   :  { %4018 = vmatprep.subr.mxu1 %v4401_v34  ;;  %4065 = vmatpush3.msra.mxu0 %v2243_v43  ;;  %v3066_v43 = vld [vmem:[%s5256_s8 + $0x80] sm:$0xff] }
 0x604   :  { %4019 = vmatpush3.msra.mxu1 %v2082_v24  ;;  %4066 = vmatprep.subr.mxu0 %v4401_v34  ;;  %v3064_v24 = vld [vmem:[%s5255_s7 + $0x2] sm:$0x3] }
 0x605   :  { %4020 = vmatprep.subr.mxu1 %v4401_v34  ;;  %4067 = vmatpush3.msra.mxu0 %v2242_v44  ;;  %v3099_v44 = vld [vmem:[%s5256_s8 + $0x178] sm:$0xff] }
 0x606   :  { %4021 = vmatpush3.msra.mxu1 %v2081_v25  ;;  %4068 = vmatprep.subr.mxu0 %v4401_v34  ;;  %v2412_v25 = vld [vmem:[%s5256_s8 + $0x78] sm:$0xff] }
 0x607   :  { %4022 = vmatprep.subr.mxu1 %v4401_v34  ;;  %4069 = vmatpush3.msra.mxu0 %v2241_v45 }
 0x608   :  { %4023 = vmatpush3.msra.mxu1 %v2080_v26  ;;  %4070 = vmatprep.subr.mxu0 %v4401_v34  ;;  %v2411_v26 = vld [vmem:[%s5256_s8 + $0x70] sm:$0xff] }
 0x609   :  { %4024 = vmatprep.subr.mxu1 %v4401_v34  ;;  %4071 = vmatpush3.msra.mxu0 %v2240_v46  ;;  %v3098_v46 = vld [vmem:[%s5256_s8 + $0x170] sm:$0xff] }
 0x60a   :  { %4025 = vmatpush3.msra.mxu1 %v2079_v27  ;;  %4072 = vmatprep.subr.mxu0 %v4401_v34  ;;  %v2410_v27 = vld [vmem:[%s5256_s8 + $0x68] sm:$0xff] }
 0x60b   :  { %4026 = vmatprep.subr.mxu1 %v4401_v34  ;;  %4073 = vmatpush3.msra.mxu0 %v2239_v47 }
 0x60c   :  { %4027 = vmatpush3.msra.mxu1 %v2078_v28  ;;  %4074 = vmatprep.subr.mxu0 %v4401_v34  ;;  %v2409_v28 = vld [vmem:[%s5256_s8 + $0x60] sm:$0xff] }
 0x60d   :  { %4028 = vmatprep.subr.mxu1 %v4401_v34  ;;  %4075 = vmatpush3.msra.mxu0 %v2238_v48 }
 0x60e   :  { %4029 = vmatpush3.msra.mxu1 %v2077_v29  ;;  %4076 = vmatprep.subr.mxu0 %v4401_v34  ;;  %v2408_v29 = vld [vmem:[%s5256_s8 + $0x58] sm:$0xff] }
 0x60f   :  { %4030 = vmatprep.subr.mxu1 %v4401_v34  ;;  %4077 = vmatpush3.msra.mxu0 %v2237_v49  ;;  %v3097_v49 = vld [vmem:[%s5256_s8 + $0x168] sm:$0xff] }
 0x610   :  { %4031 = vmatpush3.msra.mxu1 %v2076_v30  ;;  %4078 = vmatprep.subr.mxu0 %v4401_v34  ;;  %v2407_v30 = vld [vmem:[%s5256_s8 + $0x50] sm:$0xff] }
 0x611   :  { %4032 = vmatprep.subr.mxu1 %v4401_v34  ;;  %4079 = vmatpush3.msra.mxu0 %v2236_v50 }
 0x612   :  { %4033 = vmatpush3.msra.mxu1 %v2075_v31  ;;  %4080 = vmatprep.subr.mxu0 %v4401_v34  ;;  %v2406_v31 = vld [vmem:[%s5256_s8 + $0x48] sm:$0xff] }
 0x613   :  { %4034 = vmatprep.subr.mxu1 %v4401_v34  ;;  %4081 = vmatpush3.msra.mxu0 %v2235_v51  ;;  %v3082_v51 = vld [vmem:[%s5255_s7 + $0x4] sm:$0x3] }
 0x614   :  { %4035 = vmatpush3.msra.mxu1 %v2074_v32  ;;  %4082 = vmatprep.subr.mxu0 %v4401_v34  ;;  %v2405_v32 = vld [vmem:[%s5256_s8 + $0x40] sm:$0xff] }
 0x615   :  { %4036 = vmatprep.subr.mxu1 %v4401_v34  ;;  %4083 = vmatpush3.msra.mxu0 %v2234_v61  ;;  %v3092_v61 = vld [vmem:[%s5256_s8 + $0x140] sm:$0xff] }
 0x616   :  { %4037 = vmatpush3.msra.mxu1 %v2073_v33  ;;  %4084 = vmatprep.subr.mxu0 %v4401_v34  ;;  %v2404_v33 = vld [vmem:[%s5256_s8 + $0x38] sm:$0xff] }
 0x617   :  { %4038 = vmatprep.subr.mxu1 %v4401_v34 }
 0x618   :  { %4039 = vmatpush3.msra.mxu1 %v2072_v35  ;;  %v2403_v35 = vld [vmem:[%s5256_s8 + $0x30] sm:$0xff] }
 0x619   :  { %4040 = vmatprep.subr.mxu1 %v4401_v34 }
 0x61a   :  { %4041 = vmatpush3.msra.mxu1 %v2071_v36  ;;  %v2402_v36 = vld [vmem:[%s5256_s8 + $0x28] sm:$0xff] }
 0x61b   :  { %4042 = vmatprep.subr.mxu1 %v4401_v34 }
 0x61c   :  { %4043 = vmatpush3.msra.mxu1 %v2070_v37  ;;  %v2401_v37 = vld [vmem:[%s5256_s8 + $0x20] sm:$0xff] }
 0x61d   :  { %4044 = vmatprep.subr.mxu1 %v4401_v34 }
 0x61e   :  { %4045 = vmatpush3.msra.mxu1 %v2069_v38  ;;  %v2400_v38 = vld [vmem:[%s5256_s8 + $0x18] sm:$0xff] }
 0x61f   :  { %4049 = vmatprep.subr.mxu1 %v4401_v34 }
 0x6b7   :  { %v1989_v52 = vpop.f32.mrf.mxu0 }
 0x6b9   :  { %v4006_v53 = vpop.f32.mrf.mxu0 }
 0x6ba   :  { %v3095_v53 = vld [vmem:[%s5256_s8 + $0x158] sm:$0xff] }
 0x6bb   :  { %v1919_v54 = vpop.f32.mrf.mxu1 }
 0x6bc   :  { %v1990_v55 = vadd.f32 %v1989_v52, %v1919_v54  ;;  %v3096_v52 = vld [vmem:[%s5256_s8 + $0x160] sm:$0xff] }
 0x6bd   :  { %v3971_v56 = vpop.f32.mrf.mxu1  ;;  %v3100_v54 = vld [vmem:[%s5255_s7 + $0x6] sm:$0x3] }
 0x6be   :  { %v3094_v56 = vld [vmem:[%s5256_s8 + $0x150] sm:$0xff] }
 0x6bf   :  { %v2064_v57 = vpop.f32.mrf.mxu1 }
 0x6c0   :  { %4047 = vmatmul.mubr.f32.vlgmr.msra.gmra.mxu1 %v2064_v57  ;;  %v3116_v57 = vld [vmem:[%s5256_s8 + $0x1f0] sm:$0xff] }
 0x6c1   :  { %4050 = vmatpush3.msra.mxu1 %v4864_v60  ;;  %v4013_v58 = vpop.f32.mrf.mxu1  ;;  %4053 = vmatprep.mubr.msk.f32.mxu1 %vm4402_vm6, %v4401_v34  ;;  %v2233_v60 = vld [vmem:[#allocation10 + $0x188] sm:$0xff] }
 0x6c2   :  { %4051 = vmatprep.subr.mxu1 %v4401_v34  ;;  %4085 = vmatpush3.msra.mxu0 %v2233_v60  ;;  %v3093_v58 = vld [vmem:[%s5256_s8 + $0x148] sm:$0xff]  ;;  %v3114_v60 = vld [vmem:[%s5256_s8 + $0x1e0] sm:$0xff] }
 0x6c3   :  { %4052 = vmatpush3.msra.mxu1 %v4868_v62  ;;  %4086 = vmatprep.subr.mxu0 %v4401_v34 }
 0x6c4   :  { %4054 = vmatmul.mubr.msk.f32.vlgmr.msra.gmra.mxu1 %vm1671_vm9, %v2157_v59  ;;  %4091 = vmatprep.subr.mxu1 %v4401_v34  ;;  %v3115_v59 = vld [vmem:[%s5256_s8 + $0x1e8] sm:$0xff] }
 0x6c5   :  { %4093 = vmatprep.mubr.msk.f32.mxu1 %vm4402_vm6, %v4401_v34  ;;  %4087 = vmatpush3.msra.mxu0 %v2232_v63  ;;  %v3091_v63 = vld [vmem:[%s5256_s8 + $0x138] sm:$0xff] }
 0x6c6   :  { %4101 = vmatprep.subr.mxu0 %v4401_v34 }
 0x780   :  { %v2151_v62 = vpop.f32.mrf.mxu1 }
 0x781   :  { %v2155_v8 = vadd.f32 %v2151_v62, %v1990_v55  ;;  %v3117_v55 = vld [vmem:[%s5256_s8 + $0x1f8] sm:$0xff] }
 0x782   :  { %v4048_v9 = vpop.f32.mrf.mxu1  ;;  %v3113_v62 = vld [vmem:[%s5256_s8 + $0x1d8] sm:$0xff] }
 0x783   :  { %v3112_v9 = vld [vmem:[%s5256_s8 + $0x1d0] sm:$0xff] }
 0x784   :  { %v2227_v10 = vpop.f32.mrf.mxu1 }
 0x785   :  { %4089 = vmatmul.mubr.f32.vlgmr.msra.gmra.mxu0 %v2227_v10  ;;  %v3089_v10 = vld [vmem:[%s5256_s8 + $0x128] sm:$0xff] }
 0x786   :  { %v4055_v11 = vpop.f32.mrf.mxu1  ;;  %4133 = vmatprep.mubr.msk.f32.mxu0 %vm4402_vm6, %v4401_v34  ;;  %4102 = vmatpush3.msra.mxu0 %v3081_v0  ;;  %v3088_v0 = vld [vmem:[%s5256_s8 + $0x120] sm:$0xff] }
 0x787   :  { %4103 = vmatprep.subr.mxu0 %v4401_v34  ;;  %v3111_v11 = vld [vmem:[%s5256_s8 + $0x1c8] sm:$0xff] }
 0x788   :  { %4104 = vmatpush3.msra.mxu0 %v3080_v1  ;;  %v3110_v1 = vld [vmem:[%s5256_s8 + $0x1c0] sm:$0xff] }
 0x789   :  { %4105 = vmatprep.subr.mxu0 %v4401_v34 }
 0x78a   :  { %4106 = vmatpush3.msra.mxu0 %v3079_v2  ;;  %v3109_v2 = vld [vmem:[%s5256_s8 + $0x1b8] sm:$0xff] }
 0x78b   :  { %4107 = vmatprep.subr.mxu0 %v4401_v34 }
 0x78c   :  { %4108 = vmatpush3.msra.mxu0 %v3078_v3  ;;  %v3108_v3 = vld [vmem:[%s5256_s8 + $0x1b0] sm:$0xff] }
 0x78d   :  { %4109 = vmatprep.subr.mxu0 %v4401_v34 }
 0x78e   :  { %4110 = vmatpush3.msra.mxu0 %v3077_v4  ;;  %v3087_v4 = vld [vmem:[%s5256_s8 + $0x118] sm:$0xff] }
 0x78f   :  { %4111 = vmatprep.subr.mxu0 %v4401_v34 }
 0x790   :  { %4112 = vmatpush3.msra.mxu0 %v3076_v5  ;;  %v3107_v5 = vld [vmem:[%s5256_s8 + $0x1a8] sm:$0xff] }
 0x791   :  { %4113 = vmatprep.subr.mxu0 %v4401_v34 }
 0x792   :  { %4114 = vmatpush3.msra.mxu0 %v3075_v6  ;;  %v3086_v6 = vld [vmem:[%s5256_s8 + $0x110] sm:$0xff] }
 0x793   :  { %4115 = vmatprep.subr.mxu0 %v4401_v34 }
 0x794   :  { %4116 = vmatpush3.msra.mxu0 %v3074_v7  ;;  %v3106_v7 = vld [vmem:[%s5256_s8 + $0x1a0] sm:$0xff] }
 0x795   :  { %4117 = vmatprep.subr.mxu0 %v4401_v34 }
 0x796   :  { %4118 = vmatpush3.msra.mxu0 %v3073_v12  ;;  %v3085_v12 = vld [vmem:[%s5256_s8 + $0x108] sm:$0xff] }
 0x797   :  { %4119 = vmatprep.subr.mxu0 %v4401_v34 }
 0x798   :  { %4120 = vmatpush3.msra.mxu0 %v3072_v13  ;;  %v3105_v13 = vld [vmem:[%s5256_s8 + $0x198] sm:$0xff] }
 0x799   :  { %4121 = vmatprep.subr.mxu0 %v4401_v34 }
 0x79a   :  { %4122 = vmatpush3.msra.mxu0 %v3071_v14  ;;  %v3084_v14 = vld [vmem:[%s5256_s8 + $0x100] sm:$0xff] }
 0x79b   :  { %4123 = vmatprep.subr.mxu0 %v4401_v34 }
 0x79c   :  { %4124 = vmatpush3.msra.mxu0 %v3070_v15  ;;  %v3104_v15 = vld [vmem:[%s5256_s8 + $0x190] sm:$0xff] }
 0x79d   :  { %4125 = vmatprep.subr.mxu0 %v4401_v34 }
 0x79e   :  { %4126 = vmatpush3.msra.mxu0 %v3069_v16  ;;  %v3103_v16 = vld [vmem:[%s5256_s8 + $0x188] sm:$0xff] }
 0x79f   :  { %4127 = vmatprep.subr.mxu0 %v4401_v34 }
 0x7a0   :  { %4128 = vmatpush3.msra.mxu0 %v3068_v17  ;;  %v3102_v17 = vld [vmem:[%s5256_s8 + $0x180] sm:$0xff] }
 0x7a1   :  { %4129 = vmatprep.subr.mxu0 %v4401_v34 }
 0x7a2   :  { %4130 = vmatpush3.msra.mxu0 %v3067_v41 }
 0x7a3   :  { %4131 = vmatprep.subr.mxu0 %v4401_v34 }
 0x7a4   :  { %4132 = vmatpush3.msra.mxu0 %v3066_v43 }
 0x7a5   :  { %4171 = vmatprep.subr.mxu0 %v4401_v34 }
 0x845   :  { %v2314_v18 = vpop.f32.mrf.mxu0 }
 0x846   :  { %v2318_v19 = vadd.f32 %v2314_v18, %v2155_v8  ;;  %v3090_v8 = vld [vmem:[%s5256_s8 + $0x130] sm:$0xff] }
 0x847   :  { %v4090_v20 = vpop.f32.mrf.mxu0 }
 0x848   :  { %vm2319_vm10 = vcmp.ge.f32.partialorder %v2318_v19, 0.0  ;;  %v2320_v21 = vmul.f32 0.2, %v2318_v19 }
 0x84a   :  { %v5012_v23 = vsel %vm2319_vm10, %v2318_v19, %v2320_v21 }
 0x84b   :  { %4092 = vmatpush3.msra.mxu1 %v5012_v23 }
 0x84c   :  { %4094 = vmatmul.mubr.msk.f32.vlgmr.msra.gmra.mxu1 %vm2323_vm11, %v2322_v22  ;;  %4096 = vmatprep.subr.mxu1 %v4401_v34 }
 0x84d   :  { %4097 = vmatpush3.msra.mxu1 %v5012_v23  ;;  %4098 = vmatprep.mubr.msk.f32.mxu1 %vm4402_vm6, %v4401_v34 }
 0x84e   :  { %4136 = vmatprep.subr.mxu1 %v4401_v34 }
 0x850   :  { %4099 = vmatmul.mubr.msk.f32.vlgmr.msra.gmra.mxu1 %vm2323_vm11, %v3064_v24 }
 0x851   :  { %4137 = vmatpush3.msra.mxu1 %v2412_v25  ;;  %4168 = vmatprep.mubr.msk.f32.mxu1 %vm4402_vm6, %v4401_v34 }
 0x852   :  { %4138 = vmatprep.subr.mxu1 %v4401_v34 }
 0x853   :  { %4139 = vmatpush3.msra.mxu1 %v2411_v26 }
 0x854   :  { %4140 = vmatprep.subr.mxu1 %v4401_v34 }
 0x855   :  { %4141 = vmatpush3.msra.mxu1 %v2410_v27 }
 0x856   :  { %4142 = vmatprep.subr.mxu1 %v4401_v34 }
 0x857   :  { %4143 = vmatpush3.msra.mxu1 %v2409_v28 }
 0x858   :  { %4144 = vmatprep.subr.mxu1 %v4401_v34 }
 0x859   :  { %4145 = vmatpush3.msra.mxu1 %v2408_v29 }
 0x85a   :  { %4146 = vmatprep.subr.mxu1 %v4401_v34 }
 0x85b   :  { %4147 = vmatpush3.msra.mxu1 %v2407_v30 }
 0x85c   :  { %4148 = vmatprep.subr.mxu1 %v4401_v34 }
 0x85d   :  { %4149 = vmatpush3.msra.mxu1 %v2406_v31 }
 0x85e   :  { %4150 = vmatprep.subr.mxu1 %v4401_v34 }
 0x85f   :  { %4151 = vmatpush3.msra.mxu1 %v2405_v32 }
 0x860   :  { %4152 = vmatprep.subr.mxu1 %v4401_v34 }
 0x861   :  { %4153 = vmatpush3.msra.mxu1 %v2404_v33 }
 0x862   :  { %4154 = vmatprep.subr.mxu1 %v4401_v34 }
 0x863   :  { %4155 = vmatpush3.msra.mxu1 %v2403_v35 }
 0x864   :  { %4156 = vmatprep.subr.mxu1 %v4401_v34 }
 0x865   :  { %4157 = vmatpush3.msra.mxu1 %v2402_v36 }
 0x866   :  { %4158 = vmatprep.subr.mxu1 %v4401_v34 }
 0x867   :  { %4159 = vmatpush3.msra.mxu1 %v2401_v37 }
 0x868   :  { %4160 = vmatprep.subr.mxu1 %v4401_v34 }
 0x869   :  { %4161 = vmatpush3.msra.mxu1 %v2400_v38 }
 0x86a   :  { %4162 = vmatprep.subr.mxu1 %v4401_v34 }
 0x86b   :  { %4163 = vmatpush3.msra.mxu1 %v2399_v39 }
 0x86c   :  { %4164 = vmatprep.subr.mxu1 %v4401_v34 }
 0x86d   :  { %4165 = vmatpush3.msra.mxu1 %v2398_v40 }
 0x86e   :  { %4166 = vmatprep.subr.mxu1 %v4401_v34 }
 0x86f   :  { %4167 = vmatpush3.msra.mxu1 %v2397_v42 }
 0x870   :  { %4176 = vmatprep.subr.mxu1 %v4401_v34 }
 0x90c   :  { %v2393_v45 = vpop.f32.mrf.mxu1 }
 0x90d   :  { %4169 = vmatmul.mubr.f32.vlgmr.msra.gmra.mxu1 %v2393_v45 }
 0x90e   :  { %v4095_v47 = vpop.f32.mrf.mxu1  ;;  %4177 = vmatpush3.msra.mxu1 %v3099_v44  ;;  %4208 = vmatprep.mubr.msk.f32.mxu1 %vm4402_vm6, %v4401_v34 }
 0x90f   :  { %4178 = vmatprep.subr.mxu1 %v4401_v34 }
 0x910   :  { %v2484_v48 = vpop.f32.mrf.mxu1  ;;  %4179 = vmatpush3.msra.mxu1 %v3098_v46 }
 0x911   :  { %4134 = vmatmul.mubr.f32.vlgmr.msra.gmra.mxu0 %v2484_v48  ;;  %4180 = vmatprep.subr.mxu1 %v4401_v34 }
 0x912   :  { %4172 = vmatpush3.msra.mxu0 %v5012_v23  ;;  %v4100_v50 = vpop.f32.mrf.mxu1  ;;  %4173 = vmatprep.mubr.msk.f32.mxu0 %vm4402_vm6, %v4401_v34 }
 0x913   :  { %4211 = vmatprep.subr.mxu0 %v4401_v34  ;;  %4181 = vmatpush3.msra.mxu1 %v3097_v49 }
 0x914   :  { %4182 = vmatprep.subr.mxu1 %v4401_v34 }
 0x915   :  { %4174 = vmatmul.mubr.msk.f32.vlgmr.msra.gmra.mxu0 %vm2323_vm11, %v3082_v51  ;;  %4183 = vmatpush3.msra.mxu1 %v3096_v52 }
 0x916   :  { %4212 = vmatpush3.msra.mxu0 %v5012_v23  ;;  %4213 = vmatprep.mubr.msk.f32.mxu0 %vm4402_vm6, %v4401_v34 }
 0x917   :  { %4216 = vmatprep.subr.mxu0 %v4401_v34  ;;  %4184 = vmatprep.subr.mxu1 %v4401_v34 }
 0x918   :  { %4185 = vmatpush3.msra.mxu1 %v3095_v53 }
 0x919   :  { %4214 = vmatmul.mubr.msk.f32.vlgmr.msra.gmra.mxu0 %vm2323_vm11, %v3100_v54  ;;  %4186 = vmatprep.subr.mxu1 %v4401_v34 }
 0x91a   :  { %4217 = vmatpush3.msra.mxu0 %v3117_v55  ;;  %4187 = vmatpush3.msra.mxu1 %v3094_v56 }
 0x91b   :  { %4218 = vmatprep.subr.mxu0 %v4401_v34  ;;  %4188 = vmatprep.subr.mxu1 %v4401_v34 }
 0x91c   :  { %4219 = vmatpush3.msra.mxu0 %v3116_v57  ;;  %4189 = vmatpush3.msra.mxu1 %v3093_v58 }
 0x91d   :  { %4220 = vmatprep.subr.mxu0 %v4401_v34  ;;  %4190 = vmatprep.subr.mxu1 %v4401_v34 }
 0x91e   :  { %4221 = vmatpush3.msra.mxu0 %v3115_v59  ;;  %4191 = vmatpush3.msra.mxu1 %v3092_v61 }
 0x91f   :  { %4222 = vmatprep.subr.mxu0 %v4401_v34  ;;  %4192 = vmatprep.subr.mxu1 %v4401_v34 }
 0x920   :  { %4223 = vmatpush3.msra.mxu0 %v3114_v60  ;;  %4193 = vmatpush3.msra.mxu1 %v3091_v63 }
 0x921   :  { %4224 = vmatprep.subr.mxu0 %v4401_v34  ;;  %4194 = vmatprep.subr.mxu1 %v4401_v34 }
 0x922   :  { %4225 = vmatpush3.msra.mxu0 %v3113_v62  ;;  %4195 = vmatpush3.msra.mxu1 %v3090_v8 }
 0x923   :  { %4226 = vmatprep.subr.mxu0 %v4401_v34  ;;  %4196 = vmatprep.subr.mxu1 %v4401_v34 }
 0x924   :  { %4227 = vmatpush3.msra.mxu0 %v3112_v9  ;;  %4197 = vmatpush3.msra.mxu1 %v3089_v10 }
 0x925   :  { %4228 = vmatprep.subr.mxu0 %v4401_v34  ;;  %4198 = vmatprep.subr.mxu1 %v4401_v34 }
 0x926   :  { %4229 = vmatpush3.msra.mxu0 %v3111_v11  ;;  %4199 = vmatpush3.msra.mxu1 %v3088_v0 }
 0x927   :  { %4230 = vmatprep.subr.mxu0 %v4401_v34  ;;  %4200 = vmatprep.subr.mxu1 %v4401_v34 }
 0x928   :  { %4231 = vmatpush3.msra.mxu0 %v3110_v1  ;;  %4248 = vmatprep.mubr.msk.f32.mxu0 %vm4402_vm6, %v4401_v34 }
 0x929   :  { %4232 = vmatprep.subr.mxu0 %v4401_v34  ;;  %4201 = vmatpush3.msra.mxu1 %v3087_v4 }
 0x92a   :  { %4233 = vmatpush3.msra.mxu0 %v3109_v2  ;;  %4202 = vmatprep.subr.mxu1 %v4401_v34 }
 0x92b   :  { %4234 = vmatprep.subr.mxu0 %v4401_v34  ;;  %4203 = vmatpush3.msra.mxu1 %v3086_v6 }
 0x92c   :  { %4235 = vmatpush3.msra.mxu0 %v3108_v3  ;;  %4204 = vmatprep.subr.mxu1 %v4401_v34 }
 0x92d   :  { %4236 = vmatprep.subr.mxu0 %v4401_v34  ;;  %4205 = vmatpush3.msra.mxu1 %v3085_v12 }
 0x92e   :  { %4237 = vmatpush3.msra.mxu0 %v3107_v5  ;;  %4206 = vmatprep.subr.mxu1 %v4401_v34 }
 0x92f   :  { %4238 = vmatprep.subr.mxu0 %v4401_v34  ;;  %4207 = vmatpush3.msra.mxu1 %v3084_v14 }
 0x930   :  { %4239 = vmatpush3.msra.mxu0 %v3106_v7 }
 0x931   :  { %4240 = vmatprep.subr.mxu0 %v4401_v34 }
 0x932   :  { %4241 = vmatpush3.msra.mxu0 %v3105_v13 }
 0x933   :  { %4242 = vmatprep.subr.mxu0 %v4401_v34 }
 0x934   :  { %4243 = vmatpush3.msra.mxu0 %v3104_v15 }
 0x935   :  { %4244 = vmatprep.subr.mxu0 %v4401_v34 }
 0x936   :  { %4245 = vmatpush3.msra.mxu0 %v3103_v16 }
 0x937   :  { %4246 = vmatprep.subr.mxu0 %v4401_v34 }
 0x938   :  { %4247 = vmatpush3.msra.mxu0 %v3102_v17 }
 0x9cd   :  { %v2641_v18 = vpop.f32.mrf.mxu1 }
 0x9cf   :  { %v4170_v19 = vpop.f32.mrf.mxu1 }
 0x9d1   :  { %v2571_v20 = vpop.f32.mrf.mxu0 }
 0x9d2   :  { %v2642_v21 = vadd.f32 %v2641_v18, %v2571_v20 }
 0x9d3   :  { %v4135_v22 = vpop.f32.mrf.mxu0 }
 0x9d5   :  { %v2716_v23 = vpop.f32.mrf.mxu0 }
 0x9d6   :  { %4209 = vmatmul.mubr.f32.vlgmr.msra.gmra.mxu1 %v2716_v23 }
 0x9d7   :  { %v4175_v24 = vpop.f32.mrf.mxu0 }
 0x9d9   :  { %v2879_v25 = vpop.f32.mrf.mxu0 }
 0x9da   :  { %4249 = vmatmul.mubr.f32.vlgmr.msra.gmra.mxu0 %v2879_v25 }
 0x9db   :  { %v4215_v26 = vpop.f32.mrf.mxu0 }
 0xa96   :  { %v2803_v27 = vpop.f32.mrf.mxu1 }
 0xa97   :  { %v2807_v29 = vadd.f32 %v2803_v27, %v2642_v21 }
 0xa98   :  { %v4210_v28 = vpop.f32.mrf.mxu1 }
 0xa9a   :  { %v2966_v34 = vpop.f32.mrf.mxu0 }
 0xa9b   :  { %v2970_v30 = vadd.f32 %v2966_v34, %v2807_v29 }
 0xa9c   :  { %v4250_v31 = vpop.f32.mrf.mxu0 }
 0xa9d   :  { %v3118_v32 = vmul.f32 -1.442695, %v2970_v30 }
 0xa9f   :  { %4261 = vpow2.f32 %v3118_v32 }
 0xaac   :  { %v4262_v33 = vpop.eup %4261 }
 0xaad   :  { %v2974_v35 = vadd.f32 1.0, %v4262_v33 }
 0xaaf   :  { %4263 = vrcp.f32 %v2974_v35 }
 0xabc   :  { %v4264_v36 = vpop.eup %4263 }
 0xabd   :  { %2978 = vst.msk [vmem:[%s5257_s9] sm:$0x3] %vm2977_vm12, %v4264_v36 }
 0xabe   :  { %2983 = vsyncpa [#allocation3], 1 }
 0xabf   :  { %2984 = vsyncpa [#allocation5], 1 }
 0xac0   :  { %2985 = vsyncpa [#allocation8], 1 }
 0xac1   :  { %2986 = vsyncpa [#allocation11], 1 }

</bundles_post_ra>
